<compile_context>
chip_gen: v7x
topology: tpu7x:2x2x1
jax: 0.10.0
libtpu: 0.0.40
codegen_flags: <defaults>
</compile_context>

<pallas_src>
import functools
import random

import jax
import jax.numpy as jnp
from jax import lax
from jax.experimental import pallas as pl
from jax.experimental.pallas import tpu as pltpu

LAYER_NAMES = ["conv1", "bn1", "relu", "layer1", "avgpool"]
NUM_CLASSES = 10

# problem size (NHWC; the PyTorch reference is NCHW)
N, H, W, CIN, C = 2, 16, 16, 4, 8
R = N * H          # 32 rows   (sublane axis)
LC_IN = W * CIN    # 64 lanes  (input)
LC = W * C         # 128 lanes (hidden)  -> lane-dense


# ----------------------------- Pallas kernels ------------------------------

def _conv3x3_banded(x, band_ref, dm, dp):
    """3x3 'same' conv on a (rows, W*Cin) lane-dense activation.

    band_ref: (3, W*Cin, W*Cout) block-banded weights (one per kh tap, with the
    kw taps and w-boundary zero padding folded into the band structure).
    dm/dp:    (rows, rows) constant matrices giving the h-1 / h+1 row shift with
    zero rows at image boundaries, so the whole conv is 5 small MXU matmuls.
    """
    out = jnp.dot(x, band_ref[1], preferred_element_type=jnp.float32)
    out = out + jnp.dot(jnp.dot(dm, x, preferred_element_type=jnp.float32),
                        band_ref[0], preferred_element_type=jnp.float32)
    out = out + jnp.dot(jnp.dot(dp, x, preferred_element_type=jnp.float32),
                        band_ref[2], preferred_element_type=jnp.float32)
    return out


def _backbone_kernel(x_ref, band1_ref, bn1s_ref, bn1t_ref, band2_ref, b2_ref,
                     band3_ref, b3_ref, dm_ref, dp_ref, ga_ref, gp_ref,
                     conv1_o, bn1_o, relu_o, l1_o, gap_o):
    # One fused kernel for the whole feature extractor (5 feature outputs).
    x = x_ref[...]
    dm = dm_ref[...]
    dp = dp_ref[...]

    c1 = _conv3x3_banded(x, band1_ref, dm, dp)                # conv1 (pre-BN)
    conv1_o[...] = c1

    b1 = c1 * bn1s_ref[...] + bn1t_ref[...]                   # bn1 (fused affine)
    bn1_o[...] = b1

    r1 = jnp.maximum(b1, 0.0)                                 # relu
    relu_o[...] = r1

    # layer1 basic block (BN folded into banded weights / bias vectors)
    y = jnp.maximum(_conv3x3_banded(r1, band2_ref, dm, dp) + b2_ref[...], 0.0)
    y = _conv3x3_banded(y, band3_ref, dm, dp) + b3_ref[...]
    l1 = jnp.maximum(y + r1, 0.0)
    l1_o[...] = l1

    # global average pool as two tiny matmuls (ga includes the 1/(H*W) factor)
    pooled = jnp.dot(ga_ref[...], l1, preferred_element_type=jnp.float32)   # (N, W*C)
    gap_o[...] = jnp.dot(pooled, gp_ref[...], preferred_element_type=jnp.float32)  # (N, C)


def _tail_kernel(coef_ref, f1_ref, f2_ref, f3_ref, bn1s_ref, bn1t_ref,
                 band2_ref, b2_ref, band3_ref, b3_ref, dm_ref, dp_ref,
                 ga_ref, fcg_ref, fcb_ref, out_ref,
                 *, apply_bn1, apply_relu, apply_layer1):
    # mix(a,b,c) + remaining backbone layers + avgpool + flatten + fc, all fused.
    ca = coef_ref[0]
    cb = coef_ref[1]
    cc = coef_ref[2]
    z = ca * f1_ref[...] + cb * f2_ref[...] + cc * f3_ref[...]
    if apply_bn1:
        z = z * bn1s_ref[...] + bn1t_ref[...]
    if apply_relu:
        z = jnp.maximum(z, 0.0)
    if apply_layer1:
        dm = dm_ref[...]
        dp = dp_ref[...]
        y = jnp.maximum(_conv3x3_banded(z, band2_ref, dm, dp) + b2_ref[...], 0.0)
        y = _conv3x3_banded(y, band3_ref, dm, dp) + b3_ref[...]
        z = jnp.maximum(y + z, 0.0)
    pooled = jnp.dot(ga_ref[...], z, preferred_element_type=jnp.float32)    # (N, W*C)
    out_ref[...] = (jnp.dot(pooled, fcg_ref[...], preferred_element_type=jnp.float32)
                    + fcb_ref[...])


def _tail_gap_kernel(coef_ref, g1_ref, g2_ref, g3_ref, fcw_ref, fcb_ref, out_ref):
    # selected layer == avgpool: mix pooled features then fc.
    ca = coef_ref[0]
    cb = coef_ref[1]
    cc = coef_ref[2]
    g = ca * g1_ref[...] + cb * g2_ref[...] + cc * g3_ref[...]
    out_ref[...] = (jnp.dot(g, fcw_ref[...], preferred_element_type=jnp.float32)
                    + fcb_ref[...])


# ----------------------------- pallas_call wrappers ------------------------------

def _vmem():
    return pl.BlockSpec(memory_space=pltpu.MemorySpace.VMEM)


def _smem():
    return pl.BlockSpec(memory_space=pltpu.MemorySpace.SMEM)


def _backbone_call(p, x_flat):
    return pl.pallas_call(
        _backbone_kernel,
        out_shape=(
            jax.ShapeDtypeStruct((R, LC), jnp.float32),   # conv1
            jax.ShapeDtypeStruct((R, LC), jnp.float32),   # bn1
            jax.ShapeDtypeStruct((R, LC), jnp.float32),   # relu
            jax.ShapeDtypeStruct((R, LC), jnp.float32),   # layer1
            jax.ShapeDtypeStruct((N, C), jnp.float32),    # avgpool
        ),
        in_specs=[_vmem()] * 12,
        out_specs=(_vmem(), _vmem(), _vmem(), _vmem(), _vmem()),
    )(x_flat, p["band1"], p["bn1_s"], p["bn1_t"], p["band2"], p["b2"],
      p["band3"], p["b3"], p["Dm"], p["Dp"], p["gapA"], p["gapP"])


def _tail_call(p, coef, f1, f2, f3, *, apply_bn1, apply_relu, apply_layer1):
    kern = functools.partial(_tail_kernel, apply_bn1=apply_bn1,
                             apply_relu=apply_relu, apply_layer1=apply_layer1)
    return pl.pallas_call(
        kern,
        out_shape=jax.ShapeDtypeStruct((N, NUM_CLASSES), jnp.float32),
        in_specs=[_smem()] + [_vmem()] * 14,
        out_specs=_vmem(),
    )(coef, f1, f2, f3, p["bn1_s"], p["bn1_t"], p["band2"], p["b2"],
      p["band3"], p["b3"], p["Dm"], p["Dp"], p["gapA"], p["fcg"], p["fcb"])


def _tail_gap_call(p, coef, g1, g2, g3):
    return pl.pallas_call(
        _tail_gap_kernel,
        out_shape=jax.ShapeDtypeStruct((N, NUM_CLASSES), jnp.float32),
        in_specs=[_smem()] + [_vmem()] * 5,
        out_specs=_vmem(),
    )(coef, g1, g2, g3, p["fcw"], p["fcb"])


# ----------------------------- parameter construction ------------------------------

def init_raw_params(key, cin=CIN, c=C, k=NUM_CLASSES, eps=1e-5):
    ks = jax.random.split(key, 11)

    def conv_w(kk, ci, co):
        return jax.random.normal(kk, (3, 3, ci, co), jnp.float32) / jnp.sqrt(9.0 * ci)

    def bn(kg, kb):
        gamma = 1.0 + 0.1 * jax.random.normal(kg, (c,), jnp.float32)
        beta = 0.1 * jax.random.normal(kb, (c,), jnp.float32)
        mean = jnp.zeros((c,), jnp.float32)
        var = jnp.ones((c,), jnp.float32)
        scale = gamma / jnp.sqrt(var + eps)
        shift = beta - mean * scale
        return scale, shift

    raw = {
        "conv1_w": conv_w(ks[0], cin, c),
        "l1c1_w": conv_w(ks[1], c, c),
        "l1c2_w": conv_w(ks[2], c, c),
        "fc_w": jax.random.normal(ks[3], (c, k), jnp.float32) / jnp.sqrt(1.0 * c),
        "fc_b": 0.01 * jax.random.normal(ks[4], (1, k), jnp.float32),
    }
    raw["bn1_scale"], raw["bn1_shift"] = bn(ks[5], ks[6])
    raw["l1bn1_scale"], raw["l1bn1_shift"] = bn(ks[7], ks[8])
    raw["l1bn2_scale"], raw["l1bn2_shift"] = bn(ks[9], ks[10])
    return raw


def _banded_conv_weights(wc, w):
    # wc: (3, 3, cin, cout) -> (3, w*cin, w*cout) block-banded (kw taps + zero pad
    # in w baked in; one matrix per kh tap).
    _, _, cin, cout = wc.shape
    ws = jnp.arange(w)
    ind = (ws[:, None, None] == ws[None, :, None] + jnp.arange(3)[None, None, :] - 1)
    ind = ind.astype(wc.dtype)                                   # (w_src, w_dst, dw)
    band = jnp.einsum("sdq,hqio->hsido", ind, wc)                # (3, w, cin, w, cout)
    return band.reshape(3, w * cin, w * cout)


def pack_params(raw, n=N, h=H, w=W):
    c = raw["conv1_w"].shape[3]
    r = n * h
    rows = jnp.arange(r)
    hh = rows % h
    # row-shift matrices (h-1 / h+1 with zero rows at image boundaries)
    dm = (((rows[:, None] - 1) == rows[None, :]) & (hh[:, None] > 0)).astype(jnp.float32)
    dp = (((rows[:, None] + 1) == rows[None, :]) & (hh[:, None] < h - 1)).astype(jnp.float32)
    # GAP selector (includes 1/(H*W)) and per-channel summation matrix
    gap_a = (jnp.arange(n)[:, None] == (rows[None, :] // h)).astype(jnp.float32) / (h * w)
    gap_p = jnp.tile(jnp.eye(c, dtype=jnp.float32), (w, 1))

    # fold layer1 BN into the banded conv weights / per-lane bias vectors
    w2 = raw["l1c1_w"] * raw["l1bn1_scale"][None, None, None, :]
    w3 = raw["l1c2_w"] * raw["l1bn2_scale"][None, None, None, :]

    return {
        "band1": _banded_conv_weights(raw["conv1_w"], w),
        "bn1_s": jnp.tile(raw["bn1_scale"], w)[None, :],
        "bn1_t": jnp.tile(raw["bn1_shift"], w)[None, :],
        "band2": _banded_conv_weights(w2, w),
        "b2": jnp.tile(raw["l1bn1_shift"], w)[None, :],
        "band3": _banded_conv_weights(w3, w),
        "b3": jnp.tile(raw["l1bn2_shift"], w)[None, :],
        "Dm": dm,
        "Dp": dp,
        "gapA": gap_a,
        "gapP": gap_p,
        "fcg": jnp.tile(raw["fc_w"], (w, 1)),   # (w*c, k) — fc weight tiled per lane block
        "fcb": raw["fc_b"],
        "fcw": raw["fc_w"],
    }


# ----------------------------- model (jitted) ------------------------------

def _feature_extractor_impl(params, x):
    # CustomModel.featureExtractor — one fused Pallas kernel.
    x_flat = x.reshape(R, LC_IN)
    c1, b1, r1, l1, gp = _backbone_call(params, x_flat)
    return {"conv1": c1, "bn1": b1, "relu": r1, "layer1": l1, "avgpool": gp}


def _forward_impl(params, x1_feats, x2_feats, x3, coef, idx):
    # CustomModel.forward with traced mixing coefficients and layer index.
    f3 = _feature_extractor_impl(params, x3)

    def make_spatial_branch(i):
        name = LAYER_NAMES[i]

        def branch():
            return _tail_call(
                params, coef,
                lax.stop_gradient(x1_feats[name]),    # .detach()
                lax.stop_gradient(x2_feats[name]),    # .detach()
                f3[name],
                apply_bn1=i < 1, apply_relu=i < 2, apply_layer1=i < 3)
        return branch

    def gap_branch():
        return _tail_gap_call(
            params, coef,
            lax.stop_gradient(x1_feats["avgpool"]),
            lax.stop_gradient(x2_feats["avgpool"]),
            f3["avgpool"])

    branches = [make_spatial_branch(i) for i in range(4)] + [gap_branch]
    return lax.switch(idx, branches)


feature_extractor = jax.jit(_feature_extractor_impl)
_forward_jit = jax.jit(_forward_impl)


def custom_forward(params, x1_feats, x2_feats, x3):
    # Host-side randomness mirrors the PyTorch `random` usage; the drawn values are
    # fed in as traced arguments so changing them does not trigger recompilation.
    a = random.uniform(0, 1)
    b = random.uniform(0, 1 - a)
    c = 1.0 - a - b
    selected = random.choice(LAYER_NAMES)
    idx = LAYER_NAMES.index(selected)
    coef = jnp.array([a, b, c], dtype=jnp.float32)
    logits = _forward_jit(params, x1_feats, x2_feats, x3, coef,
                          jnp.asarray(idx, dtype=jnp.int32))
    return logits, coef, idx


# ----------------------------- pure-JAX reference (for validation) ------------------------------

def _ref_conv(x, wc):
    return lax.conv_general_dilated(
        x, wc, window_strides=(1, 1), padding="SAME",
        dimension_numbers=("NHWC", "HWIO", "NHWC"),
        precision=lax.Precision.HIGHEST)


def ref_layer(raw, name, x):
    if name == "conv1":
        return _ref_conv(x, raw["conv1_w"])
    if name == "bn1":
        return x * raw["bn1_scale"] + raw["bn1_shift"]
    if name == "relu":
        return jnp.maximum(x, 0.0)
    if name == "layer1":
        y = jnp.maximum(_ref_conv(x, raw["l1c1_w"]) * raw["l1bn1_scale"]
                        + raw["l1bn1_shift"], 0.0)
        y = _ref_conv(y, raw["l1c2_w"]) * raw["l1bn2_scale"] + raw["l1bn2_shift"]
        return jnp.maximum(y + x, 0.0)
    if name == "avgpool":
        return jnp.mean(x, axis=(1, 2))
    raise ValueError(name)


def ref_backbone_features(raw, x):
    feats = {}
    for name in LAYER_NAMES:
        x = ref_layer(raw, name, x)
        feats[name] = x
    return feats


def ref_forward(raw, f1d, f2d, f3d, coef, idx):
    name = LAYER_NAMES[idx]
    x = coef[0] * f1d[name] + coef[1] * f2d[name] + coef[2] * f3d[name]
    for nm in LAYER_NAMES[idx + 1:]:
        x = ref_layer(raw, nm, x)
    x_in = x.reshape(x.shape[0], -1)
    return jnp.dot(x_in, raw["fc_w"], precision=lax.Precision.HIGHEST) + raw["fc_b"]


# ----------------------------- main ------------------------------

if __name__ == "__main__":
    random.seed(0)  # deterministic a, b, c and layer choice
    key = jax.random.PRNGKey(0)
    pkey, k1, k2, k3 = jax.random.split(key, 4)

    raw = init_raw_params(pkey)
    params = pack_params(raw)

    # NHWC inputs: batch=2, spatial=16x16, channels=4
    x1 = jax.random.normal(k1, (N, H, W, CIN), jnp.float32)
    x2 = jax.random.normal(k2, (N, H, W, CIN), jnp.float32)
    x3 = jax.random.normal(k3, (N, H, W, CIN), jnp.float32)

    x1_feats = feature_extractor(params, x1)
    x2_feats = feature_extractor(params, x2)
    logits, coef, idx = custom_forward(params, x1_feats, x2_feats, x3)
    logits = jax.block_until_ready(logits)

    assert logits.shape == (N, NUM_CLASSES), logits.shape
    assert bool(jnp.all(jnp.isfinite(logits)))

    # numerical check against a pure-JAX reference of the same model
    ref1 = ref_backbone_features(raw, x1)
    ref2 = ref_backbone_features(raw, x2)
    ref3 = ref_backbone_features(raw, x3)
    for nm in LAYER_NAMES[:-1]:
        got = x1_feats[nm].reshape(N, H, W, C)
        assert bool(jnp.allclose(got, ref1[nm], atol=5e-2, rtol=5e-2)), nm
    assert bool(jnp.allclose(x1_feats["avgpool"], ref1["avgpool"], atol=5e-2, rtol=5e-2))
    ref_logits = ref_forward(raw, ref1, ref2, ref3, coef, idx)
    assert bool(jnp.allclose(logits, ref_logits, atol=5e-2, rtol=5e-2))

    print("KERNEL_OK")
</pallas_src>

<mosaic_0001>
module attributes {stable_mosaic.version = 11 : i64} {
  func.func @_backbone_kernel(%arg0: memref<32x64xf32, #tpu.memory_space<vmem>>, %arg1: memref<3x64x128xf32, #tpu.memory_space<vmem>>, %arg2: memref<1x128xf32, #tpu.memory_space<vmem>>, %arg3: memref<1x128xf32, #tpu.memory_space<vmem>>, %arg4: memref<3x128x128xf32, #tpu.memory_space<vmem>>, %arg5: memref<1x128xf32, #tpu.memory_space<vmem>>, %arg6: memref<3x128x128xf32, #tpu.memory_space<vmem>>, %arg7: memref<1x128xf32, #tpu.memory_space<vmem>>, %arg8: memref<32x32xf32, #tpu.memory_space<vmem>>, %arg9: memref<32x32xf32, #tpu.memory_space<vmem>>, %arg10: memref<2x32xf32, #tpu.memory_space<vmem>>, %arg11: memref<128x8xf32, #tpu.memory_space<vmem>>, %arg12: memref<32x128xf32, #tpu.memory_space<vmem>>, %arg13: memref<32x128xf32, #tpu.memory_space<vmem>>, %arg14: memref<32x128xf32, #tpu.memory_space<vmem>>, %arg15: memref<32x128xf32, #tpu.memory_space<vmem>>, %arg16: memref<2x8xf32, #tpu.memory_space<vmem>>) attributes {dimension_semantics = [], scalar_prefetch = 0 : i64, scratch_operands = 0 : i64, tpu.core_type = #tpu.core_type<tc>} {
    %c0 = arith.constant 0 : index
    %c0_0 = arith.constant 0 : index
    %0 = vector.load %arg0[%c0, %c0_0] : memref<32x64xf32, #tpu.memory_space<vmem>>, vector<32x64xf32>
    %c0_1 = arith.constant 0 : index
    %c0_2 = arith.constant 0 : index
    %1 = vector.load %arg8[%c0_1, %c0_2] : memref<32x32xf32, #tpu.memory_space<vmem>>, vector<32x32xf32>
    %c0_3 = arith.constant 0 : index
    %c0_4 = arith.constant 0 : index
    %2 = vector.load %arg9[%c0_3, %c0_4] : memref<32x32xf32, #tpu.memory_space<vmem>>, vector<32x32xf32>
    %c1 = arith.constant 1 : index
    %c0_5 = arith.constant 0 : index
    %c0_6 = arith.constant 0 : index
    %3 = vector.load %arg1[%c1, %c0_5, %c0_6] : memref<3x64x128xf32, #tpu.memory_space<vmem>>, vector<1x64x128xf32>
    %4 = vector.shape_cast %3 : vector<1x64x128xf32> to vector<64x128xf32>
    %cst = arith.constant dense<0.000000e+00> : vector<32x128xf32>
    %5 = tpu.matmul %0, %4, %cst {dimension_numbers = #tpu.dot_dimension_numbers<[1], [0], [0], [1], [0, 0, 1, 1], [], []>} : vector<32x64xf32>, vector<64x128xf32>, vector<32x128xf32> -> vector<32x128xf32>
    %cst_7 = arith.constant dense<0.000000e+00> : vector<32x64xf32>
    %6 = tpu.matmul %1, %0, %cst_7 {dimension_numbers = #tpu.dot_dimension_numbers<[1], [0], [0], [1], [0, 0, 1, 1], [], []>} : vector<32x32xf32>, vector<32x64xf32>, vector<32x64xf32> -> vector<32x64xf32>
    %c0_8 = arith.constant 0 : index
    %c0_9 = arith.constant 0 : index
    %c0_10 = arith.constant 0 : index
    %7 = vector.load %arg1[%c0_8, %c0_9, %c0_10] : memref<3x64x128xf32, #tpu.memory_space<vmem>>, vector<1x64x128xf32>
    %8 = vector.shape_cast %7 : vector<1x64x128xf32> to vector<64x128xf32>
    %cst_11 = arith.constant dense<0.000000e+00> : vector<32x128xf32>
    %9 = tpu.matmul %6, %8, %cst_11 {dimension_numbers = #tpu.dot_dimension_numbers<[1], [0], [0], [1], [0, 0, 1, 1], [], []>} : vector<32x64xf32>, vector<64x128xf32>, vector<32x128xf32> -> vector<32x128xf32>
    %10 = arith.addf %5, %9 : vector<32x128xf32>
    %cst_12 = arith.constant dense<0.000000e+00> : vector<32x64xf32>
    %11 = tpu.matmul %2, %0, %cst_12 {dimension_numbers = #tpu.dot_dimension_numbers<[1], [0], [0], [1], [0, 0, 1, 1], [], []>} : vector<32x32xf32>, vector<32x64xf32>, vector<32x64xf32> -> vector<32x64xf32>
    %c2 = arith.constant 2 : index
    %c0_13 = arith.constant 0 : index
    %c0_14 = arith.constant 0 : index
    %12 = vector.load %arg1[%c2, %c0_13, %c0_14] : memref<3x64x128xf32, #tpu.memory_space<vmem>>, vector<1x64x128xf32>
    %13 = vector.shape_cast %12 : vector<1x64x128xf32> to vector<64x128xf32>
    %cst_15 = arith.constant dense<0.000000e+00> : vector<32x128xf32>
    %14 = tpu.matmul %11, %13, %cst_15 {dimension_numbers = #tpu.dot_dimension_numbers<[1], [0], [0], [1], [0, 0, 1, 1], [], []>} : vector<32x64xf32>, vector<64x128xf32>, vector<32x128xf32> -> vector<32x128xf32>
    %15 = arith.addf %10, %14 : vector<32x128xf32>
    %c0_16 = arith.constant 0 : index
    %c0_17 = arith.constant 0 : index
    %16 = vector.load %arg12[%c0_16, %c0_17] : memref<32x128xf32, #tpu.memory_space<vmem>>, vector<32x128xf32>
    tpu.vector_store %arg12[%c0_16, %c0_17], %15 {strides = array<i32>} : memref<32x128xf32, #tpu.memory_space<vmem>>, vector<32x128xf32>,
    %c0_18 = arith.constant 0 : index
    %c0_19 = arith.constant 0 : index
    %17 = vector.load %arg2[%c0_18, %c0_19] : memref<1x128xf32, #tpu.memory_space<vmem>>, vector<1x128xf32>
    %18 = vector.broadcast %17 : vector<1x128xf32> to vector<32x128xf32>
    %19 = arith.mulf %15, %18 : vector<32x128xf32>
    %c0_20 = arith.constant 0 : index
    %c0_21 = arith.constant 0 : index
    %20 = vector.load %arg3[%c0_20, %c0_21] : memref<1x128xf32, #tpu.memory_space<vmem>>, vector<1x128xf32>
    %21 = vector.broadcast %20 : vector<1x128xf32> to vector<32x128xf32>
    %22 = arith.addf %19, %21 : vector<32x128xf32>
    %c0_22 = arith.constant 0 : index
    %c0_23 = arith.constant 0 : index
    %23 = vector.load %arg13[%c0_22, %c0_23] : memref<32x128xf32, #tpu.memory_space<vmem>>, vector<32x128xf32>
    tpu.vector_store %arg13[%c0_22, %c0_23], %22 {strides = array<i32>} : memref<32x128xf32, #tpu.memory_space<vmem>>, vector<32x128xf32>,
    %cst_24 = arith.constant 0.000000e+00 : f32
    %24 = vector.broadcast %cst_24 : f32 to vector<32x128xf32>
    %25 = arith.maximumf %22, %24 : vector<32x128xf32>
    %c0_25 = arith.constant 0 : index
    %c0_26 = arith.constant 0 : index
    %26 = vector.load %arg14[%c0_25, %c0_26] : memref<32x128xf32, #tpu.memory_space<vmem>>, vector<32x128xf32>
    tpu.vector_store %arg14[%c0_25, %c0_26], %25 {strides = array<i32>} : memref<32x128xf32, #tpu.memory_space<vmem>>, vector<32x128xf32>,
    %c1_27 = arith.constant 1 : index
    %c0_28 = arith.constant 0 : index
    %c0_29 = arith.constant 0 : index
    %27 = vector.load %arg4[%c1_27, %c0_28, %c0_29] : memref<3x128x128xf32, #tpu.memory_space<vmem>>, vector<1x128x128xf32>
    %28 = vector.shape_cast %27 : vector<1x128x128xf32> to vector<128x128xf32>
    %cst_30 = arith.constant dense<0.000000e+00> : vector<32x128xf32>
    %29 = tpu.matmul %25, %28, %cst_30 {dimension_numbers = #tpu.dot_dimension_numbers<[1], [0], [0], [1], [0, 0, 1, 1], [], []>} : vector<32x128xf32>, vector<128x128xf32>, vector<32x128xf32> -> vector<32x128xf32>
    %cst_31 = arith.constant dense<0.000000e+00> : vector<32x128xf32>
    %30 = tpu.matmul %1, %25, %cst_31 {dimension_numbers = #tpu.dot_dimension_numbers<[1], [0], [0], [1], [0, 0, 1, 1], [], []>} : vector<32x32xf32>, vector<32x128xf32>, vector<32x128xf32> -> vector<32x128xf32>
    %c0_32 = arith.constant 0 : index
    %c0_33 = arith.constant 0 : index
    %c0_34 = arith.constant 0 : index
    %31 = vector.load %arg4[%c0_32, %c0_33, %c0_34] : memref<3x128x128xf32, #tpu.memory_space<vmem>>, vector<1x128x128xf32>
    %32 = vector.shape_cast %31 : vector<1x128x128xf32> to vector<128x128xf32>
    %cst_35 = arith.constant dense<0.000000e+00> : vector<32x128xf32>
    %33 = tpu.matmul %30, %32, %cst_35 {dimension_numbers = #tpu.dot_dimension_numbers<[1], [0], [0], [1], [0, 0, 1, 1], [], []>} : vector<32x128xf32>, vector<128x128xf32>, vector<32x128xf32> -> vector<32x128xf32>
    %34 = arith.addf %29, %33 : vector<32x128xf32>
    %cst_36 = arith.constant dense<0.000000e+00> : vector<32x128xf32>
    %35 = tpu.matmul %2, %25, %cst_36 {dimension_numbers = #tpu.dot_dimension_numbers<[1], [0], [0], [1], [0, 0, 1, 1], [], []>} : vector<32x32xf32>, vector<32x128xf32>, vector<32x128xf32> -> vector<32x128xf32>
    %c2_37 = arith.constant 2 : index
    %c0_38 = arith.constant 0 : index
    %c0_39 = arith.constant 0 : index
    %36 = vector.load %arg4[%c2_37, %c0_38, %c0_39] : memref<3x128x128xf32, #tpu.memory_space<vmem>>, vector<1x128x128xf32>
    %37 = vector.shape_cast %36 : vector<1x128x128xf32> to vector<128x128xf32>
    %cst_40 = arith.constant dense<0.000000e+00> : vector<32x128xf32>
    %38 = tpu.matmul %35, %37, %cst_40 {dimension_numbers = #tpu.dot_dimension_numbers<[1], [0], [0], [1], [0, 0, 1, 1], [], []>} : vector<32x128xf32>, vector<128x128xf32>, vector<32x128xf32> -> vector<32x128xf32>
    %39 = arith.addf %34, %38 : vector<32x128xf32>
    %c0_41 = arith.constant 0 : index
    %c0_42 = arith.constant 0 : index
    %40 = vector.load %arg5[%c0_41, %c0_42] : memref<1x128xf32, #tpu.memory_space<vmem>>, vector<1x128xf32>
    %41 = vector.broadcast %40 : vector<1x128xf32> to vector<32x128xf32>
    %42 = arith.addf %39, %41 : vector<32x128xf32>
    %cst_43 = arith.constant 0.000000e+00 : f32
    %43 = vector.broadcast %cst_43 : f32 to vector<32x128xf32>
    %44 = arith.maximumf %42, %43 : vector<32x128xf32>
    %c1_44 = arith.constant 1 : index
    %c0_45 = arith.constant 0 : index
    %c0_46 = arith.constant 0 : index
    %45 = vector.load %arg6[%c1_44, %c0_45, %c0_46] : memref<3x128x128xf32, #tpu.memory_space<vmem>>, vector<1x128x128xf32>
    %46 = vector.shape_cast %45 : vector<1x128x128xf32> to vector<128x128xf32>
    %cst_47 = arith.constant dense<0.000000e+00> : vector<32x128xf32>
    %47 = tpu.matmul %44, %46, %cst_47 {dimension_numbers = #tpu.dot_dimension_numbers<[1], [0], [0], [1], [0, 0, 1, 1], [], []>} : vector<32x128xf32>, vector<128x128xf32>, vector<32x128xf32> -> vector<32x128xf32>
    %cst_48 = arith.constant dense<0.000000e+00> : vector<32x128xf32>
    %48 = tpu.matmul %1, %44, %cst_48 {dimension_numbers = #tpu.dot_dimension_numbers<[1], [0], [0], [1], [0, 0, 1, 1], [], []>} : vector<32x32xf32>, vector<32x128xf32>, vector<32x128xf32> -> vector<32x128xf32>
    %c0_49 = arith.constant 0 : index
    %c0_50 = arith.constant 0 : index
    %c0_51 = arith.constant 0 : index
    %49 = vector.load %arg6[%c0_49, %c0_50, %c0_51] : memref<3x128x128xf32, #tpu.memory_space<vmem>>, vector<1x128x128xf32>
    %50 = vector.shape_cast %49 : vector<1x128x128xf32> to vector<128x128xf32>
    %cst_52 = arith.constant dense<0.000000e+00> : vector<32x128xf32>
    %51 = tpu.matmul %48, %50, %cst_52 {dimension_numbers = #tpu.dot_dimension_numbers<[1], [0], [0], [1], [0, 0, 1, 1], [], []>} : vector<32x128xf32>, vector<128x128xf32>, vector<32x128xf32> -> vector<32x128xf32>
    %52 = arith.addf %47, %51 : vector<32x128xf32>
    %cst_53 = arith.constant dense<0.000000e+00> : vector<32x128xf32>
    %53 = tpu.matmul %2, %44, %cst_53 {dimension_numbers = #tpu.dot_dimension_numbers<[1], [0], [0], [1], [0, 0, 1, 1], [], []>} : vector<32x32xf32>, vector<32x128xf32>, vector<32x128xf32> -> vector<32x128xf32>
    %c2_54 = arith.constant 2 : index
    %c0_55 = arith.constant 0 : index
    %c0_56 = arith.constant 0 : index
    %54 = vector.load %arg6[%c2_54, %c0_55, %c0_56] : memref<3x128x128xf32, #tpu.memory_space<vmem>>, vector<1x128x128xf32>
    %55 = vector.shape_cast %54 : vector<1x128x128xf32> to vector<128x128xf32>
    %cst_57 = arith.constant dense<0.000000e+00> : vector<32x128xf32>
    %56 = tpu.matmul %53, %55, %cst_57 {dimension_numbers = #tpu.dot_dimension_numbers<[1], [0], [0], [1], [0, 0, 1, 1], [], []>} : vector<32x128xf32>, vector<128x128xf32>, vector<32x128xf32> -> vector<32x128xf32>
    %57 = arith.addf %52, %56 : vector<32x128xf32>
    %c0_58 = arith.constant 0 : index
    %c0_59 = arith.constant 0 : index
    %58 = vector.load %arg7[%c0_58, %c0_59] : memref<1x128xf32, #tpu.memory_space<vmem>>, vector<1x128xf32>
    %59 = vector.broadcast %58 : vector<1x128xf32> to vector<32x128xf32>
    %60 = arith.addf %57, %59 : vector<32x128xf32>
    %61 = arith.addf %60, %25 : vector<32x128xf32>
    %cst_60 = arith.constant 0.000000e+00 : f32
    %62 = vector.broadcast %cst_60 : f32 to vector<32x128xf32>
    %63 = arith.maximumf %61, %62 : vector<32x128xf32>
    %c0_61 = arith.constant 0 : index
    %c0_62 = arith.constant 0 : index
    %64 = vector.load %arg15[%c0_61, %c0_62] : memref<32x128xf32, #tpu.memory_space<vmem>>, vector<32x128xf32>
    tpu.vector_store %arg15[%c0_61, %c0_62], %63 {strides = array<i32>} : memref<32x128xf32, #tpu.memory_space<vmem>>, vector<32x128xf32>,
    %c0_63 = arith.constant 0 : index
    %c0_64 = arith.constant 0 : index
    %65 = vector.load %arg10[%c0_63, %c0_64] : memref<2x32xf32, #tpu.memory_space<vmem>>, vector<2x32xf32>
    %cst_65 = arith.constant dense<0.000000e+00> : vector<2x128xf32>
    %66 = tpu.matmul %65, %63, %cst_65 {dimension_numbers = #tpu.dot_dimension_numbers<[1], [0], [0], [1], [0, 0, 1, 1], [], []>} : vector<2x32xf32>, vector<32x128xf32>, vector<2x128xf32> -> vector<2x128xf32>
    %c0_66 = arith.constant 0 : index
    %c0_67 = arith.constant 0 : index
    %67 = vector.load %arg11[%c0_66, %c0_67] : memref<128x8xf32, #tpu.memory_space<vmem>>, vector<128x8xf32>
    %cst_68 = arith.constant dense<0.000000e+00> : vector<2x8xf32>
    %68 = tpu.matmul %66, %67, %cst_68 {dimension_numbers = #tpu.dot_dimension_numbers<[1], [0], [0], [1], [0, 0, 1, 1], [], []>} : vector<2x128xf32>, vector<128x8xf32>, vector<2x8xf32> -> vector<2x8xf32>
    %c0_69 = arith.constant 0 : index
    %c0_70 = arith.constant 0 : index
    %69 = vector.load %arg16[%c0_69, %c0_70] : memref<2x8xf32, #tpu.memory_space<vmem>>, vector<2x8xf32>
    tpu.vector_store %arg16[%c0_69, %c0_70], %68 {strides = array<i32>} : memref<2x8xf32, #tpu.memory_space<vmem>>, vector<2x8xf32>,
    return
  }
}

</mosaic_0001>

<bundles_post_ra>
// kernel: _feature_extractor_impl.1
= control target key start
LH: loop header
LB: loop body
LE: loop exit
PB: predicated region body
PF: predicated region fallthrough
CT: control target
= control target key end

     0   :  { %s3784_s0 = inlined_call_operand.vmem [shape: f32[32,64], index: 0, kind: input, shape index: {}]   ;;  %s3785_s1 = inlined_call_operand.vmem [shape: f32[3,64,128], index: 1, kind: input, shape index: {}]   ;;  %s3786_s2 = inlined_call_operand.vmem [shape: f32[1,128], index: 2, kind: input, shape index: {}]   ;;  %s3787_s3 = inlined_call_operand.vmem [shape: f32[1,128], index: 3, kind: input, shape index: {}]   ;;  %s3788_s4 = inlined_call_operand.vmem [shape: f32[3,128,128], index: 4, kind: input, shape index: {}]   ;;  %s3789_s5 = inlined_call_operand.vmem [shape: f32[1,128], index: 5, kind: input, shape index: {}]   ;;  %s3790_s6 = inlined_call_operand.hbm [shape: f32[3,128,128], index: 6, kind: input, shape index: {}]   ;;  %s3791_s7 = inlined_call_operand.vmem [shape: f32[1,128], index: 7, kind: input, shape index: {}]   ;;  %s3792_s8 = inlined_call_operand.vmem [shape: f32[32,32], index: 8, kind: input, shape index: {}]   ;;  %s3793_s9 = inlined_call_operand.vmem [shape: f32[32,32], index: 9, kind: input, shape index: {}]   ;;  %s3794_s10 = inlined_call_operand.vmem [shape: f32[2,32], index: 10, kind: input, shape index: {}]   ;;  %s3795_s11 = inlined_call_operand.vmem [shape: f32[128,8], index: 11, kind: input, shape index: {}]   ;;  %s3796_s12 = inlined_call_operand.hbm [shape: f32[32,128], index: 12, kind: output, shape index: {0}]   ;;  %s3797_s13 = inlined_call_operand.hbm [shape: f32[32,128], index: 13, kind: output, shape index: {1}]   ;;  %s3798_s14 = inlined_call_operand.hbm [shape: f32[32,128], index: 14, kind: output, shape index: {2}]   ;;  %s3799_s15 = inlined_call_operand.hbm [shape: f32[32,128], index: 15, kind: output, shape index: {3}]   ;;  %s3800_s16 = inlined_call_operand.hbm [shape: f32[2,8], index: 16, kind: output, shape index: {4}]  }
   0x1   :  { %3802 = sst [smem:[#allocation16_spill]] %s3784_s0 }
   0x2   :  { %22 = vsyncpa [#allocation3], 0 }
   0x3   :  { %23 = vsyncpa [#allocation4], 0 }
   0x4   :  { %24 = vsyncpa [#allocation7], 0 }
   0x5   :  { %25 = vsyncpa [#allocation10], 0  ;;  %s3097_s21 = smov [#allocation2]   ;;  %s2957_s25 = scalar_lea.hbm %s3790_s6, 6144 }
   0x6   :  { %s43_s22 = sshll.u32 %s3097_s21, 4  ;;  %p2958_p0 = scmp.ne.s32.totalorder %s3790_s6, %s2957_s25  ;;  %s44_s22 = int_to_ptr.vmem [resolvable:$true] %s43_s22 }
   0x7   :  { %p2961_p1 = scmp.lt.u32.totalorder %s2957_s25, %s3790_s6 }
   0x9   :  { %p2963_p2 = pnand %p2961_p1, %p2958_p0 }
   0xb   :  { %2966 = shalt.err (!%p2963_p2)
}
   0xc   :  { %s2967_s30 = scalar_lea.vmem %s44_s22, 6144  ;;  %p2972_p4 = scmp.lt.s32.totalorder %s44_s22, %s44_s22 }
   0xd   :  { %p2968_p3 = scmp.ne.s32.totalorder %s44_s22, %s2967_s30  ;;  %p2973_p5 = scmp.lt.s32.totalorder %s2967_s30, %s2967_s30 }
   0xf   :  { %p2974_p6 = por %p2973_p5, %p2972_p4 }
  0x11   :  { %p2975_p7 = pnand %p2974_p6, %p2968_p3 }
  0x13   :  { %2978 = shalt.err (!%p2975_p7)
}
  0x14   :  { %s3098_s0 = smov 128   ;;  %s3099_s17 = smov 8  }
  0x15   :  { %49 = dma.hbm_to_vmem [thread:$0]  %s3790_s6, 6144, %s44_s22, [#allocation3], %s3098_s0, %s3098_s0, %s3099_s17  }
  0x16   :  { %3089 = dma.done.wait [#allocation3], 6144  }
  0x17   :  { %3090 = vsyncadd [#allocation3], 4294961152  ;;  %vm84_vm0 = vcmask 261120   ;;  %s3803_s23 = sld [smem:[#allocation16_spill]]  ;;  %v3233_v5 = vld [vmem:[%s3792_s8] sm:$0xff]  ;;  %v183_v8 = vld [vmem:[%s3785_s1 + $0x8] sm:$0xff] }
  0x18   :  { %2188 = vmatprep.mubr.msk.f32.mxu0 %vm84_vm0, %v3233_v5  ;;  %v182_v7 = vld [vmem:[%s3785_s1] sm:$0xff]  ;;  %v184_v9 = vld [vmem:[%s3785_s1 + $0x10] sm:$0xff]  ;;  %v185_v11 = vld [vmem:[%s3785_s1 + $0x18] sm:$0xff]  ;;  %vm190_vm1 = vcmask 523264   ;;  %vm3101_vm2 = vmmov 0   ;;  %s3103_s28 = smov [#allocation6]  }
  0x19   :  { %v2612_v10 = vpack.c.bf16 %v183_v8, %v182_v7  ;;  %v2616_v12 = vpack.c.bf16 %v185_v11, %v184_v9  ;;  %v186_v13 = vld [vmem:[%s3785_s1 + $0x20] sm:$0xff]  ;;  %v187_v14 = vld [vmem:[%s3785_s1 + $0x28] sm:$0xff]  ;;  %v3265_v16 = vld [vmem:[%s3792_s8 + $0x10] sm:$0xff]  ;;  %s1805_s29 = sshll.u32 %s3103_s28, 4  ;;  %s3104_s30 = smov [#allocation9]   ;;  %s1806_s29 = int_to_ptr.vmem [resolvable:$true] %s1805_s29 }
  0x1a   :  { %v3260_v15 = vld [vmem:[%s3792_s8 + $0x8] sm:$0xff]  ;;  %v2620_v17 = vpack.c.bf16 %v187_v14, %v186_v13  ;;  %v188_v18 = vld [vmem:[%s3785_s1 + $0x30] sm:$0xff]  ;;  %v189_v19 = vld [vmem:[%s3785_s1 + $0x38] sm:$0xff]  ;;  %s2979_s18 = scalar_lea.vmem %s1806_s29, 512  ;;  %p2984_p9 = scmp.lt.s32.totalorder %s1806_s29, %s1806_s29 }
  0x1b   :  { %2613 = vmatprep.subr.bf16.mxu1 %v2612_v10  ;;  %v3280_v20 = vld [vmem:[%s3792_s8 + $0x18] sm:$0xff]  ;;  %v3285_v21 = vld [vmem:[%s3793_s9] sm:$0xff]  ;;  %v2624_v22 = vpack.c.bf16 %v189_v19, %v188_v18  ;;  %v3294_v23 = vld [vmem:[%s3793_s9 + $0x8] sm:$0xff]  ;;  %p2980_p8 = scmp.ne.s32.totalorder %s1806_s29, %s2979_s18  ;;  %p2985_p10 = scmp.lt.s32.totalorder %s2979_s18, %s2979_s18 }
  0x1c   :  { %2615 = vmatpush3.bf16.msra.mxu1 %v2612_v10  ;;  %v3299_v24 = vld [vmem:[%s3793_s9 + $0x10] sm:$0xff]  ;;  %v3308_v25 = vld [vmem:[%s3793_s9 + $0x18] sm:$0xff]  ;;  %v1865_v26 = vld [vmem:[%s3785_s1 + $0x40] sm:$0xff] }
  0x1d   :  { %v3211_v0 = vld [vmem:[%s3803_s23] sm:$0xff]  ;;  %v3216_v1 = vld [vmem:[%s3803_s23 + $0x8] sm:$0xff]  ;;  %v3221_v2 = vld [vmem:[%s3803_s23 + $0x10] sm:$0xff]  ;;  %2617 = vmatprep.subr.bf16.mxu1 %v2616_v12  ;;  %p2986_p11 = por %p2985_p10, %p2984_p9 }
  0x1e   :  { %v2604_v3 = vpack.c.bf16 %v3216_v1, %v3211_v0  ;;  %v3228_v4 = vld [vmem:[%s3803_s23 + $0x18] sm:$0xff]  ;;  %v1866_v27 = vld [vmem:[%s3785_s1 + $0x48] sm:$0xff]  ;;  %v1867_v29 = vld [vmem:[%s3785_s1 + $0x50] sm:$0xff] }
  0x1f   :  { %v2608_v6 = vpack.c.bf16 %v3228_v4, %v3221_v2  ;;  %v2628_v28 = vpack.c.bf16 %v1866_v27, %v1865_v26  ;;  %v1868_v30 = vld [vmem:[%s3785_s1 + $0x58] sm:$0xff]  ;;  %v1869_v34 = vld [vmem:[%s3785_s1 + $0x60] sm:$0xff]  ;;  %v1870_v35 = vld [vmem:[%s3785_s1 + $0x68] sm:$0xff]  ;;  %p2987_p12 = pnand %p2986_p11, %p2980_p8 }
  0x20   :  { %2605 = vmatprep.subr.bf16.mxu0 %v2604_v3  ;;  %2619 = vmatpush3.bf16.msra.mxu1 %v2616_v12  ;;  %v2632_v33 = vpack.c.bf16 %v1868_v30, %v1867_v29  ;;  %v2636_v37 = vpack.c.bf16 %v1870_v35, %v1869_v34  ;;  %v1871_v39 = vld [vmem:[%s3785_s1 + $0x70] sm:$0xff]  ;;  %v1872_v40 = vld [vmem:[%s3785_s1 + $0x78] sm:$0xff]  ;;  %v1889_v44 = vld [vmem:[%s3785_s1 + $0x80] sm:$0xff] }
  0x21   :  { %2607 = vmatpush3.bf16.msra.mxu0 %v2604_v3  ;;  %2621 = vmatprep.subr.bf16.mxu1 %v2620_v17  ;;  %v2640_v42 = vpack.c.bf16 %v1872_v40, %v1871_v39  ;;  %v1890_v45 = vld [vmem:[%s3785_s1 + $0x88] sm:$0xff]  ;;  %v1891_v49 = vld [vmem:[%s3785_s1 + $0x90] sm:$0xff]  ;;  %v1892_v50 = vld [vmem:[%s3785_s1 + $0x98] sm:$0xff] }
  0x22   :  { %2609 = vmatprep.subr.bf16.mxu0 %v2608_v6  ;;  %v2652_v47 = vpack.c.bf16 %v1890_v45, %v1889_v44  ;;  %v2656_v51 = vpack.c.bf16 %v1892_v50, %v1891_v49  ;;  %v1893_v52 = vld [vmem:[%s3785_s1 + $0xa0] sm:$0xff]  ;;  %v1894_v53 = vld [vmem:[%s3785_s1 + $0xa8] sm:$0xff]  ;;  %v1895_v55 = vld [vmem:[%s3785_s1 + $0xb0] sm:$0xff] }
  0x23   :  { %v2660_v54 = vpack.c.bf16 %v1894_v53, %v1893_v52  ;;  %v1896_v56 = vld [vmem:[%s3785_s1 + $0xb8] sm:$0xff]  ;;  %v1901_v58 = vld [vmem:[%s3786_s2] ss:$0 sm:$0xff]  ;;  %v733_v14 = vld [vmem:[%s3788_s4 + $0x8] sm:$0xff]  ;;  %s1829_s1 = sshll.u32 %s3104_s30, 4  ;;  %s3698_s1 = int_to_ptr.vmem [resolvable:$true] %s1829_s1 }
  0x24   :  { %2623 = vmatpush3.bf16.msra.mxu1 %v2620_v17  ;;  %v2664_v57 = vpack.c.bf16 %v1896_v56, %v1895_v55  ;;  %v1902_v60 = vld [vmem:[%s3787_s3] ss:$0 sm:$0xff]  ;;  %v735_v26 = vld [vmem:[%s3788_s4 + $0x18] sm:$0xff]  ;;  %v737_v29 = vld [vmem:[%s3788_s4 + $0x28] sm:$0xff] }
  0x25   :  { %2611 = vmatpush3.bf16.msra.mxu0 %v2608_v6  ;;  %2625 = vmatprep.subr.bf16.mxu1 %v2624_v22  ;;  %v732_v13 = vld [vmem:[%s3788_s4] sm:$0xff]  ;;  %v741_v35 = vld [vmem:[%s3788_s4 + $0x48] sm:$0xff]  ;;  %v1906_v49 = vld [vmem:[%s3788_s4 + $0x98] sm:$0xff] }
  0x26   :  { %2645 = vmatprep.subr.bf16.mxu0 %v2604_v3  ;;  %v2676_v19 = vpack.c.bf16 %v733_v14, %v732_v13  ;;  %v740_v34 = vld [vmem:[%s3788_s4 + $0x40] sm:$0xff]  ;;  %v745_v40 = vld [vmem:[%s3788_s4 + $0x68] sm:$0xff]  ;;  %v1917_v14 = vld [vmem:[%s3788_s4 + $0xf0] sm:$0xff] }
  0x27   :  { %v744_v39 = vld [vmem:[%s3788_s4 + $0x60] sm:$0xff]  ;;  %v1908_v56 = vld [vmem:[%s3788_s4 + $0xa8] sm:$0xff] }
  0x28   :  { %2189 = vmatmul.mubr.msk.f32.vlgmr.msra.gmra.mrb[0].mxu0 %vm84_vm0, %v3260_v15  ;;  %2627 = vmatpush3.bf16.msra.mxu1 %v2624_v22  ;;  %v734_v22 = vld [vmem:[%s3788_s4 + $0x10] sm:$0xff]  ;;  %v1903_v45 = vld [vmem:[%s3788_s4 + $0x80] sm:$0xff] }
  0x29   :  { %2191 = vmatprep.mubr.msk.f32.mxu0 %vm84_vm0, %v3265_v16  ;;  %2647 = vmatpush3.bf16.msra.mxu0 %v2604_v3  ;;  %v2680_v27 = vpack.c.bf16 %v735_v26, %v734_v22  ;;  %v1907_v55 = vld [vmem:[%s3788_s4 + $0xa0] sm:$0xff]  ;;  %v1928_v26 = vld [vmem:[%s3788_s4 + $0x108] sm:$0xff] }
  0x2a   :  { %2649 = vmatprep.subr.bf16.mxu0 %v2608_v6  ;;  %2629 = vmatprep.subr.bf16.mxu1 %v2628_v28  ;;  %v1927_v22 = vld [vmem:[%s3788_s4 + $0x100] sm:$0xff] }
  0x2c   :  { %2192 = vmatmul.mubr.msk.f32.gmra.mrb[2].mxu0 %vm84_vm0, %v3280_v20 }
  0x2d   :  { %2651 = vmatpush3.bf16.msra.mxu0 %v2608_v6  ;;  %2246 = vmatprep.mubr.msk.f32.mxu0 %vm84_vm0, %v3285_v21 }
  0x30   :  { %2247 = vmatmul.mubr.msk.f32.vlgmr.msra.gmra.mrb[4].mxu0 %vm84_vm0, %v3294_v23 }
  0x31   :  { %2249 = vmatprep.mubr.msk.f32.mxu0 %vm84_vm0, %v3299_v24 }
  0x34   :  { %2250 = vmatmul.mubr.msk.f32.gmra.mrb[6].mxu0 %vm84_vm0, %v3308_v25 }
  0x35   :  { %2282 = vmatprep.mubr.msk.f32.mxu0 %vm84_vm0, %v3233_v5 }
  0xfb   :  { %v2190_v31 = vpop.f32.mrb[0].mxu0 }
  0xfc   :  { %v163_v32 = vpop.f32.mrb[1].mxu0 }
  0xfd   :  { %2210 = vmatprep.mubr.msk.f32.mxu1 %vm190_vm1, %v163_v32  ;;  %v739_v32 = vld [vmem:[%s3788_s4 + $0x38] sm:$0xff] }
  0xfe   :  { %2211 = vmatmul.mubr.msk.f32.vlgmr.msra.gmra.mrb[0].mxu1 %vm190_vm1, %v2190_v31  ;;  %v738_v31 = vld [vmem:[%s3788_s4 + $0x30] sm:$0xff] }
  0xff   :  { %2631 = vmatpush3.bf16.msra.mxu1 %v2628_v28  ;;  %v2193_v36 = vpop.f32.mrb[2].mxu0  ;;  %v736_v28 = vld [vmem:[%s3788_s4 + $0x20] sm:$0xff] }
 0x100   :  { %2633 = vmatprep.subr.bf16.mxu1 %v2632_v33  ;;  %v173_v38 = vpop.f32.mrb[3].mxu0  ;;  %v2684_v30 = vpack.c.bf16 %v737_v29, %v736_v28  ;;  %v1929_v28 = vld [vmem:[%s3788_s4 + $0x110] sm:$0xff]  ;;  %v1930_v29 = vld [vmem:[%s3788_s4 + $0x118] sm:$0xff] }
 0x101   :  { %2213 = vmatprep.mubr.msk.f32.mxu1 %vm190_vm1, %v173_v38 }
 0x102   :  { %2214 = vmatmul.mubr.msk.f32.gmra.mrb[2].mxu1 %vm190_vm1, %v2193_v36  ;;  %v2692_v36 = vpack.c.bf16 %v741_v35, %v740_v34  ;;  %v1933_v34 = vld [vmem:[%s3788_s4 + $0x130] sm:$0xff]  ;;  %v1934_v35 = vld [vmem:[%s3788_s4 + $0x138] sm:$0xff] }
 0x103   :  { %2635 = vmatpush3.bf16.msra.mxu1 %v2632_v33  ;;  %2232 = vmatprep.mubr.msk.f32.mxu1 %vm190_vm1, %v3211_v0  ;;  %v2248_v41 = vpop.f32.mrb[4].mxu0  ;;  %v2688_v33 = vpack.c.bf16 %v739_v32, %v738_v31  ;;  %v1931_v31 = vld [vmem:[%s3788_s4 + $0x120] sm:$0xff]  ;;  %v1932_v32 = vld [vmem:[%s3788_s4 + $0x128] sm:$0xff] }
 0x104   :  { %2637 = vmatprep.subr.bf16.mxu1 %v2636_v37  ;;  %v463_v43 = vpop.f32.mrb[5].mxu0 }
 0x107   :  { %2639 = vmatpush3.bf16.msra.mxu1 %v2636_v37  ;;  %v2251_v46 = vpop.f32.mrb[6].mxu0  ;;  %v742_v37 = vld [vmem:[%s3788_s4 + $0x50] sm:$0xff] }
 0x108   :  { %2641 = vmatprep.subr.bf16.mxu1 %v2640_v42  ;;  %v473_v48 = vpop.f32.mrb[7].mxu0 }
 0x10b   :  { %2643 = vmatpush3.bf16.msra.mxu1 %v2640_v42  ;;  %v746_v42 = vld [vmem:[%s3788_s4 + $0x70] sm:$0xff] }
 0x10c   :  { %2653 = vmatprep.subr.bf16.mxu1 %v2652_v47 }
 0x10e   :  { %2233 = vmatmul.mubr.msk.f32.vlgmr.msra.gmra.mrb[0].mxu1 %vm190_vm1, %v3216_v1 }
 0x10f   :  { %2655 = vmatpush3.bf16.msra.mxu1 %v2652_v47  ;;  %2235 = vmatprep.mubr.msk.f32.mxu1 %vm190_vm1, %v3221_v2 }
 0x110   :  { %2657 = vmatprep.subr.bf16.mxu1 %v2656_v51 }
 0x112   :  { %2236 = vmatmul.mubr.msk.f32.gmra.mrb[2].mxu1 %vm190_vm1, %v3228_v4 }
 0x113   :  { %2659 = vmatpush3.bf16.msra.mxu1 %v2656_v51  ;;  %2268 = vmatprep.mubr.msk.f32.mxu1 %vm190_vm1, %v463_v43  ;;  %v747_v43 = vld [vmem:[%s3788_s4 + $0x78] sm:$0xff] }
 0x114   :  { %2661 = vmatprep.subr.bf16.mxu1 %v2660_v54  ;;  %v2704_v44 = vpack.c.bf16 %v747_v43, %v746_v42  ;;  %v1939_v42 = vld [vmem:[%s3788_s4 + $0x160] sm:$0xff]  ;;  %v1940_v43 = vld [vmem:[%s3788_s4 + $0x168] sm:$0xff] }
 0x117   :  { %2663 = vmatpush3.bf16.msra.mxu1 %v2660_v54 }
 0x118   :  { %2665 = vmatprep.subr.bf16.mxu1 %v2664_v57 }
 0x11b   :  { %2667 = vmatpush3.bf16.msra.mxu1 %v2664_v57 }
 0x11e   :  { %2269 = vmatmul.mubr.msk.f32.vlgmr.msra.gmra.mrb[0].mxu1 %vm190_vm1, %v2248_v41  ;;  %v2700_v41 = vpack.c.bf16 %v745_v40, %v744_v39  ;;  %v1937_v39 = vld [vmem:[%s3788_s4 + $0x150] sm:$0xff]  ;;  %v1938_v40 = vld [vmem:[%s3788_s4 + $0x158] sm:$0xff] }
 0x11f   :  { %2271 = vmatprep.mubr.msk.f32.mxu1 %vm190_vm1, %v473_v48  ;;  %v1905_v48 = vld [vmem:[%s3788_s4 + $0x90] sm:$0xff] }
 0x120   :  { %v2712_v53 = vpack.c.bf16 %v1906_v49, %v1905_v48  ;;  %v1943_v48 = vld [vmem:[%s3789_s5] ss:$0 sm:$0xff] }
 0x122   :  { %2272 = vmatmul.mubr.msk.f32.gmra.mrb[2].mxu1 %vm190_vm1, %v2251_v46  ;;  %v1904_v46 = vld [vmem:[%s3788_s4 + $0x88] sm:$0xff] }
 0x123   :  { %2372 = vmatprep.mubr.msk.f32.mxu1 %vm84_vm0, %v3285_v21  ;;  %v2708_v47 = vpack.c.bf16 %v1904_v46, %v1903_v45  ;;  %v1941_v45 = vld [vmem:[%s3788_s4 + $0x170] sm:$0xff]  ;;  %v1942_v46 = vld [vmem:[%s3788_s4 + $0x178] sm:$0xff] }
 0x1f1   :  { %v2270_v59 = vpop.f32.mrb[0].mxu1 }
 0x1f2   :  { %593 = vst [vmem:[#allocation5 + $0x8] sm:$0xff] %v2270_v59  ;;  %v604_v61 = vmul.f32 %v2270_v59, %v1901_v58  ;;  %v569_v62 = vpop.f32.mrb[1].mxu1 }
 0x1f3   :  { %592 = vst [vmem:[#allocation5] sm:$0xff] %v569_v62  ;;  %v603_v63 = vmul.f32 %v1901_v58, %v569_v62  ;;  %v1909_v62 = vld [vmem:[%s3788_s4 + $0xb0] sm:$0xff] }
 0x1f4   :  { %v615_v0 = vadd.f32 %v1902_v60, %v604_v61 }
 0x1f5   :  { %v614_v1 = vadd.f32 %v1902_v60, %v603_v63  ;;  %v2273_v2 = vpop.f32.mrb[2].mxu1  ;;  %v1910_v63 = vld [vmem:[%s3788_s4 + $0xb8] sm:$0xff] }
 0x1f6   :  { %619 = vst [vmem:[#allocation6 + $0x8] sm:$0xff] %v615_v0  ;;  %v3386_v3 = vmax.f32 %v615_v0, 0.0  ;;  %595 = vst [vmem:[#allocation5 + $0x18] sm:$0xff] %v2273_v2  ;;  %v606_v4 = vmul.f32 %v2273_v2, %v1901_v58  ;;  %v579_v6 = vpop.f32.mrb[3].mxu1  ;;  %v2720_v0 = vpack.c.bf16 %v1910_v63, %v1909_v62  ;;  %v1912_v2 = vld [vmem:[%s3788_s4 + $0xc8] sm:$0xff] }
 0x1f7   :  { %618 = vst [vmem:[#allocation6] sm:$0xff] %v614_v1  ;;  %v3388_v7 = vmax.f32 %v614_v1, 0.0  ;;  %594 = vst [vmem:[#allocation5 + $0x10] sm:$0xff] %v579_v6  ;;  %v605_v8 = vmul.f32 %v1901_v58, %v579_v6  ;;  %v1911_v1 = vld [vmem:[%s3788_s4 + $0xc0] sm:$0xff]  ;;  %v1913_v6 = vld [vmem:[%s3788_s4 + $0xd0] sm:$0xff] }
 0x1f8   :  { %627 = vst [vmem:[#allocation8 + $0x8] sm:$0xff] %v3386_v3  ;;  %v617_v9 = vadd.f32 %v1902_v60, %v606_v4  ;;  %v2724_v4 = vpack.c.bf16 %v1912_v2, %v1911_v1  ;;  %v1228_v1 = vld [vmem:[#allocation2 + $0x10] sm:$0xff]  ;;  %v1229_v2 = vld [vmem:[#allocation2 + $0x18] sm:$0xff] }
 0x1f9   :  { %626 = vst [vmem:[#allocation8] sm:$0xff] %v3388_v7  ;;  %v616_v10 = vadd.f32 %v1902_v60, %v605_v8  ;;  %v2668_v11 = vpack.c.bf16 %v3386_v3, %v3388_v7  ;;  %v2716_v60 = vpack.c.bf16 %v1908_v56, %v1907_v55  ;;  %v1914_v8 = vld [vmem:[%s3788_s4 + $0xd8] sm:$0xff] }
 0x1fa   :  { %621 = vst [vmem:[#allocation6 + $0x18] sm:$0xff] %v617_v9  ;;  %v3394_v12 = vmax.f32 %v617_v9, 0.0  ;;  %v2728_v9 = vpack.c.bf16 %v1914_v8, %v1913_v6  ;;  %v1230_v6 = vld [vmem:[#allocation2 + $0x20] sm:$0xff]  ;;  %v1231_v8 = vld [vmem:[#allocation2 + $0x28] sm:$0xff] }
 0x1fb   :  { %620 = vst [vmem:[#allocation6 + $0x10] sm:$0xff] %v616_v10  ;;  %v3402_v17 = vmax.f32 %v616_v10, 0.0  ;;  %2669 = vmatprep.subr.bf16.mxu0 %v2668_v11  ;;  %2741 = vmatprep.subr.bf16.mxu1 %v2668_v11  ;;  %v1915_v10 = vld [vmem:[%s3788_s4 + $0xe0] sm:$0xff] }
 0x1fc   :  { %629 = vst [vmem:[#allocation8 + $0x18] sm:$0xff] %v3394_v12  ;;  %2671 = vmatpush3.bf16.msra.mxu0 %v2668_v11  ;;  %2743 = vmatpush3.bf16.msra.mxu1 %v2668_v11  ;;  %v1916_v11 = vld [vmem:[%s3788_s4 + $0xe8] sm:$0xff] }
 0x1fd   :  { %628 = vst [vmem:[#allocation8 + $0x10] sm:$0xff] %v3402_v17  ;;  %v2672_v18 = vpack.c.bf16 %v3394_v12, %v3402_v17  ;;  %v2732_v13 = vpack.c.bf16 %v1916_v11, %v1915_v10  ;;  %v1233_v10 = vld [vmem:[#allocation2 + $0x38] sm:$0xff]  ;;  %v1234_v11 = vld [vmem:[#allocation2 + $0x40] sm:$0xff] }
 0x1ff   :  { %2673 = vmatprep.subr.bf16.mxu0 %v2672_v18  ;;  %2745 = vmatprep.subr.bf16.mxu1 %v2672_v18 }
 0x200   :  { %2675 = vmatpush3.bf16.msra.mxu0 %v2672_v18  ;;  %2747 = vmatpush3.bf16.msra.mxu1 %v2672_v18  ;;  %v1918_v18 = vld [vmem:[%s3788_s4 + $0xf8] sm:$0xff] }
 0x201   :  { %2677 = vmatprep.subr.bf16.mxu0 %v2676_v19 }
 0x203   :  { %2283 = vmatmul.mubr.msk.f32.vlgmr.msra.gmra.mrb[8].mxu0 %vm84_vm0, %v3260_v15  ;;  %2373 = vmatmul.mubr.msk.f32.vlgmr.msra.gmra.mrb[4].mxu1 %vm84_vm0, %v3294_v23 }
 0x204   :  { %2285 = vmatprep.mubr.msk.f32.mxu0 %vm84_vm0, %v3265_v16  ;;  %2375 = vmatprep.mubr.msk.f32.mxu1 %vm84_vm0, %v3299_v24 }
 0x205   :  { %2679 = vmatpush3.bf16.msra.mxu0 %v2676_v19  ;;  %v2736_v19 = vpack.c.bf16 %v1918_v18, %v1917_v14  ;;  %v1237_v14 = vld [vmem:[#allocation2 + $0x58] sm:$0xff] }
 0x206   :  { %2681 = vmatprep.subr.bf16.mxu0 %v2680_v27 }
 0x207   :  { %2286 = vmatmul.mubr.msk.f32.gmra.mrb[10].mxu0 %vm84_vm0, %v3280_v20  ;;  %2376 = vmatmul.mubr.msk.f32.gmra.mrb[6].mxu1 %vm84_vm0, %v3308_v25 }
 0x208   :  { %2424 = vmatprep.mubr.msk.f32.mxu1 %vm84_vm0, %v3233_v5  ;;  %v743_v5 = vld [vmem:[%s3788_s4 + $0x58] sm:$0xff] }
 0x209   :  { %2683 = vmatpush3.bf16.msra.mxu0 %v2680_v27  ;;  %v2696_v38 = vpack.c.bf16 %v743_v5, %v742_v37  ;;  %v2748_v27 = vpack.c.bf16 %v1928_v26, %v1927_v22  ;;  %v1935_v37 = vld [vmem:[%s3788_s4 + $0x140] sm:$0xff]  ;;  %v1936_v5 = vld [vmem:[%s3788_s4 + $0x148] sm:$0xff]  ;;  %v1240_v22 = vld [vmem:[#allocation2 + $0x70] sm:$0xff] }
 0x20a   :  { %2685 = vmatprep.subr.bf16.mxu0 %v2684_v30  ;;  %v1241_v26 = vld [vmem:[#allocation2 + $0x78] sm:$0xff] }
 0x20d   :  { %2687 = vmatpush3.bf16.msra.mxu0 %v2684_v30  ;;  %v2752_v30 = vpack.c.bf16 %v1930_v29, %v1929_v28  ;;  %v1125_v28 = vld [vmem:[#allocation2 + $0x80] sm:$0xff]  ;;  %v1126_v29 = vld [vmem:[#allocation2 + $0x88] sm:$0xff] }
 0x20e   :  { %2689 = vmatprep.subr.bf16.mxu0 %v2688_v33 }
 0x211   :  { %2691 = vmatpush3.bf16.msra.mxu0 %v2688_v33  ;;  %v2756_v33 = vpack.c.bf16 %v1932_v32, %v1931_v31  ;;  %v1127_v31 = vld [vmem:[#allocation2 + $0x90] sm:$0xff]  ;;  %v1128_v32 = vld [vmem:[#allocation2 + $0x98] sm:$0xff] }
 0x212   :  { %2693 = vmatprep.subr.bf16.mxu0 %v2692_v36 }
 0x215   :  { %2695 = vmatpush3.bf16.msra.mxu0 %v2692_v36  ;;  %v2760_v36 = vpack.c.bf16 %v1934_v35, %v1933_v34 }
 0x216   :  { %2697 = vmatprep.subr.bf16.mxu0 %v2696_v38 }
 0x219   :  { %2699 = vmatpush3.bf16.msra.mxu0 %v2696_v38  ;;  %v2764_v38 = vpack.c.bf16 %v1936_v5, %v1935_v37  ;;  %v1129_v5 = vld [vmem:[#allocation2 + $0xa0] sm:$0xff] }
 0x21a   :  { %2701 = vmatprep.subr.bf16.mxu0 %v2700_v41 }
 0x21d   :  { %2703 = vmatpush3.bf16.msra.mxu0 %v2700_v41  ;;  %v2768_v41 = vpack.c.bf16 %v1938_v40, %v1937_v39 }
 0x21e   :  { %2705 = vmatprep.subr.bf16.mxu0 %v2704_v44 }
 0x221   :  { %2707 = vmatpush3.bf16.msra.mxu0 %v2704_v44  ;;  %v2772_v44 = vpack.c.bf16 %v1940_v43, %v1939_v42 }
 0x222   :  { %2709 = vmatprep.subr.bf16.mxu0 %v2708_v47 }
 0x2d6   :  { %v2284_v50 = vpop.f32.mrb[8].mxu0  ;;  %v3476_v51 = vpop.f32.mrb[4].mxu1 }
 0x2d7   :  { %v713_v52 = vpop.f32.mrb[9].mxu0  ;;  %v984_v54 = vpop.f32.mrb[5].mxu1 }
 0x2d8   :  { %2320 = vmatprep.mubr.f32.mxu0 %v713_v52 }
 0x2d9   :  { %2321 = vmatmul.mubr.f32.vlgmr.msra.gmra.mrb[12].mxu0 %v2284_v50 }
 0x2da   :  { %2711 = vmatpush3.bf16.msra.mxu0 %v2708_v47  ;;  %v2287_v57 = vpop.f32.mrb[10].mxu0  ;;  %v3484_v58 = vpop.f32.mrb[6].mxu1  ;;  %v2776_v47 = vpack.c.bf16 %v1942_v46, %v1941_v45  ;;  %v1132_v45 = vld [vmem:[#allocation2 + $0xb8] sm:$0xff] }
 0x2db   :  { %v723_v59 = vpop.f32.mrb[11].mxu0  ;;  %2713 = vmatprep.subr.bf16.mxu0 %v2712_v53  ;;  %v3486_v61 = vpop.f32.mrb[7].mxu1 }
 0x2dc   :  { %2323 = vmatprep.mubr.f32.mxu0 %v723_v59 }
 0x2dd   :  { %2324 = vmatmul.mubr.f32.gmra.mrb[14].mxu0 %v2287_v57 }
 0x2de   :  { %2715 = vmatpush3.bf16.msra.mxu0 %v2712_v53  ;;  %2358 = vmatprep.mubr.f32.mxu0 %v3388_v7 }
 0x2df   :  { %2717 = vmatprep.subr.bf16.mxu0 %v2716_v60 }
 0x2e2   :  { %2719 = vmatpush3.bf16.msra.mxu0 %v2716_v60  ;;  %v1226_v60 = vld [vmem:[#allocation2] sm:$0xff] }
 0x2e3   :  { %2721 = vmatprep.subr.bf16.mxu0 %v2720_v0 }
 0x2e6   :  { %2723 = vmatpush3.bf16.msra.mxu0 %v2720_v0 }
 0x2e7   :  { %2725 = vmatprep.subr.bf16.mxu0 %v2724_v4 }
 0x2ea   :  { %2727 = vmatpush3.bf16.msra.mxu0 %v2724_v4  ;;  %v2792_v4 = vpack.c.bf16 %v1229_v2, %v1228_v1  ;;  %v1499_v1 = vld [vmem:[#allocation2 + $0x108] sm:$0xff] }
 0x2eb   :  { %2729 = vmatprep.subr.bf16.mxu0 %v2728_v9 }
 0x2ee   :  { %2731 = vmatpush3.bf16.msra.mxu0 %v2728_v9  ;;  %v2796_v9 = vpack.c.bf16 %v1231_v8, %v1230_v6  ;;  %v1501_v6 = vld [vmem:[#allocation2 + $0x118] sm:$0xff] }
 0x2ef   :  { %2733 = vmatprep.subr.bf16.mxu0 %v2732_v13 }
 0x2f2   :  { %2735 = vmatpush3.bf16.msra.mxu0 %v2732_v13  ;;  %v1235_v13 = vld [vmem:[#allocation2 + $0x48] sm:$0xff] }
 0x2f3   :  { %2737 = vmatprep.subr.bf16.mxu0 %v2736_v19 }
 0x2f6   :  { %2739 = vmatpush3.bf16.msra.mxu0 %v2736_v19  ;;  %v1238_v19 = vld [vmem:[#allocation2 + $0x60] sm:$0xff] }
 0x2f7   :  { %2749 = vmatprep.subr.bf16.mxu0 %v2748_v27 }
 0x2f9   :  { %2359 = vmatmul.mubr.f32.vlgmr.msra.gmra.mrb[12].mxu0 %v3386_v3 }
 0x2fa   :  { %2361 = vmatprep.mubr.f32.mxu0 %v3402_v17  ;;  %2751 = vmatpush3.bf16.msra.mxu0 %v2748_v27  ;;  %v2816_v27 = vpack.c.bf16 %v1241_v26, %v1240_v22  ;;  %v3102_v22 = vmov 0.0   ;;  %v1952_v26 = vld [vmem:[%s3791_s7] ss:$0 sm:$0xff] }
 0x2fb   :  { %2753 = vmatprep.subr.bf16.mxu0 %v2752_v30 }
 0x2fd   :  { %2362 = vmatmul.mubr.f32.gmra.mrb[14].mxu0 %v3394_v12 }
 0x2fe   :  { %2755 = vmatpush3.bf16.msra.mxu0 %v2752_v30  ;;  %2410 = vmatprep.mubr.f32.mxu0 %v984_v54  ;;  %v2820_v30 = vpack.c.bf16 %v1126_v29, %v1125_v28 }
 0x2ff   :  { %2757 = vmatprep.subr.bf16.mxu0 %v2756_v33 }
 0x302   :  { %2759 = vmatpush3.bf16.msra.mxu0 %v2756_v33 }
 0x303   :  { %2761 = vmatprep.subr.bf16.mxu0 %v2760_v36 }
 0x306   :  { %2763 = vmatpush3.bf16.msra.mxu0 %v2760_v36  ;;  %v2824_v36 = vpack.c.bf16 %v1128_v32, %v1127_v31 }
 0x307   :  { %2765 = vmatprep.subr.bf16.mxu0 %v2764_v38 }
 0x30a   :  { %2767 = vmatpush3.bf16.msra.mxu0 %v2764_v38  ;;  %v1130_v38 = vld [vmem:[#allocation2 + $0xa8] sm:$0xff] }
 0x30b   :  { %2769 = vmatprep.subr.bf16.mxu0 %v2768_v41  ;;  %v2828_v42 = vpack.c.bf16 %v1130_v38, %v1129_v5 }
 0x30e   :  { %2771 = vmatpush3.bf16.msra.mxu0 %v2768_v41 }
 0x30f   :  { %2773 = vmatprep.subr.bf16.mxu0 %v2772_v44 }
 0x312   :  { %2775 = vmatpush3.bf16.msra.mxu0 %v2772_v44  ;;  %v1131_v44 = vld [vmem:[#allocation2 + $0xb0] sm:$0xff] }
 0x313   :  { %2777 = vmatprep.subr.bf16.mxu0 %v2776_v47  ;;  %v2832_v46 = vpack.c.bf16 %v1132_v45, %v1131_v44  ;;  %v1702_v44 = vld [vmem:[%s3795_s11 + $0x10] sm:$0xff]  ;;  %v1703_v45 = vld [vmem:[%s3795_s11 + $0x18] sm:$0xff] }
 0x316   :  { %2779 = vmatpush3.bf16.msra.mxu0 %v2776_v47  ;;  %v1133_v47 = vld [vmem:[#allocation2 + $0xc0] sm:$0xff] }
 0x319   :  { %2411 = vmatmul.mubr.f32.vlgmr.msra.gmra.mrb[12].mxu0 %v3476_v51 }
 0x31a   :  { %2413 = vmatprep.mubr.f32.mxu0 %v3486_v61  ;;  %v1227_v61 = vld [vmem:[#allocation2 + $0x8] sm:$0xff] }
 0x31b   :  { %v2788_v0 = vpack.c.bf16 %v1227_v61, %v1226_v60  ;;  %v1138_v60 = vld [vmem:[#allocation2 + $0xe8] sm:$0xff] }
 0x31d   :  { %2414 = vmatmul.mubr.f32.gmra.mrb[14].mxu0 %v3484_v58 }
 0x31e   :  { %2514 = vmatprep.mubr.msk.f32.mxu0 %vm84_vm0, %v3285_v21 }
 0x3ec   :  { %v2412_v49 = vpop.f32.mrb[12].mxu0 }
 0x3ed   :  { %v3578_v50 = vadd.f32 %v2412_v49, %v1943_v48  ;;  %v1086_v52 = vpop.f32.mrb[13].mxu0 }
 0x3ee   :  { %v3580_v53 = vadd.f32 %v1943_v48, %v1086_v52  ;;  %v1135_v52 = vld [vmem:[#allocation2 + $0xd0] sm:$0xff] }
 0x3ef   :  { %v1121_v54 = vmax.f32 %v3578_v50, 0.0 }
 0x3f0   :  { %v1120_v51 = vmax.f32 %v3580_v53, 0.0  ;;  %v2415_v55 = vpop.f32.mrb[14].mxu0  ;;  %v1140_v53 = vld [vmem:[#allocation2 + $0xf8] sm:$0xff] }
 0x3f1   :  { %v3584_v56 = vadd.f32 %v2415_v55, %v1943_v48  ;;  %v1096_v57 = vpop.f32.mrb[15].mxu0  ;;  %v1136_v55 = vld [vmem:[#allocation2 + $0xd8] sm:$0xff] }
 0x3f2   :  { %v2780_v21 = vpack.c.bf16 %v1121_v54, %v1120_v51  ;;  %v3590_v58 = vadd.f32 %v1943_v48, %v1096_v57  ;;  %v1134_v48 = vld [vmem:[#allocation2 + $0xc8] sm:$0xff]  ;;  %v2840_v57 = vpack.c.bf16 %v1136_v55, %v1135_v52  ;;  %v1706_v52 = vld [vmem:[%s3795_s11 + $0x30] sm:$0xff]  ;;  %v1707_v55 = vld [vmem:[%s3795_s11 + $0x38] sm:$0xff] }
 0x3f3   :  { %v1123_v59 = vmax.f32 %v3584_v56, 0.0  ;;  %v2836_v49 = vpack.c.bf16 %v1134_v48, %v1133_v47  ;;  %v1704_v47 = vld [vmem:[%s3795_s11 + $0x20] sm:$0xff]  ;;  %v1705_v48 = vld [vmem:[%s3795_s11 + $0x28] sm:$0xff] }
 0x3f4   :  { %v1122_v62 = vmax.f32 %v3590_v58, 0.0  ;;  %2781 = vmatprep.subr.bf16.mxu1 %v2780_v21  ;;  %2853 = vmatprep.subr.bf16.mxu0 %v2780_v21  ;;  %v1509_v58 = vld [vmem:[#allocation2 + $0x158] sm:$0xff] }
 0x3f5   :  { %2783 = vmatpush3.bf16.msra.mxu1 %v2780_v21  ;;  %2855 = vmatpush3.bf16.msra.mxu0 %v2780_v21  ;;  %v1137_v21 = vld [vmem:[#allocation2 + $0xe0] sm:$0xff] }
 0x3f6   :  { %v2784_v63 = vpack.c.bf16 %v1123_v59, %v1122_v62  ;;  %v2844_v61 = vpack.c.bf16 %v1138_v60, %v1137_v21  ;;  %v1708_v21 = vld [vmem:[%s3795_s11 + $0x40] sm:$0xff]  ;;  %v1709_v60 = vld [vmem:[%s3795_s11 + $0x48] sm:$0xff] }
 0x3f8   :  { %2785 = vmatprep.subr.bf16.mxu1 %v2784_v63  ;;  %2857 = vmatprep.subr.bf16.mxu0 %v2784_v63 }
 0x3f9   :  { %2787 = vmatpush3.bf16.msra.mxu1 %v2784_v63  ;;  %2859 = vmatpush3.bf16.msra.mxu0 %v2784_v63  ;;  %v1139_v63 = vld [vmem:[#allocation2 + $0xf0] sm:$0xff] }
 0x3fa   :  { %2789 = vmatprep.subr.bf16.mxu1 %v2788_v0 }
 0x3fc   :  { %2425 = vmatmul.mubr.msk.f32.vlgmr.msra.gmra.mrb[8].mxu1 %vm84_vm0, %v3260_v15  ;;  %2515 = vmatmul.mubr.msk.f32.vlgmr.msra.gmra.mrb[16].mxu0 %vm84_vm0, %v3294_v23  ;;  %v1232_v15 = vld [vmem:[#allocation2 + $0x30] sm:$0xff] }
 0x3fd   :  { %2427 = vmatprep.mubr.msk.f32.mxu1 %vm84_vm0, %v3265_v16  ;;  %2517 = vmatprep.mubr.msk.f32.mxu0 %vm84_vm0, %v3299_v24  ;;  %v2800_v23 = vpack.c.bf16 %v1233_v10, %v1232_v15  ;;  %v2804_v16 = vpack.c.bf16 %v1235_v13, %v1234_v11  ;;  %v1236_v24 = vld [vmem:[#allocation2 + $0x50] sm:$0xff]  ;;  %v1503_v15 = vld [vmem:[#allocation2 + $0x128] sm:$0xff]  ;;  %v1505_v11 = vld [vmem:[#allocation2 + $0x138] sm:$0xff] }
 0x3fe   :  { %2791 = vmatpush3.bf16.msra.mxu1 %v2788_v0  ;;  %v2808_v18 = vpack.c.bf16 %v1237_v14, %v1236_v24  ;;  %v1498_v0 = vld [vmem:[#allocation2 + $0x100] sm:$0xff]  ;;  %v1507_v24 = vld [vmem:[#allocation2 + $0x148] sm:$0xff] }
 0x3ff   :  { %2793 = vmatprep.subr.bf16.mxu1 %v2792_v4  ;;  %v2860_v2 = vpack.c.bf16 %v1499_v1, %v1498_v0  ;;  %v1510_v14 = vld [vmem:[#allocation2 + $0x160] sm:$0xff]  ;;  %v1713_v1 = vld [vmem:[%s3795_s11 + $0x68] sm:$0xff] }
 0x400   :  { %2428 = vmatmul.mubr.msk.f32.gmra.mrb[10].mxu1 %vm84_vm0, %v3280_v20  ;;  %2518 = vmatmul.mubr.msk.f32.gmra.mrb[18].mxu0 %vm84_vm0, %v3308_v25  ;;  %v1239_v20 = vld [vmem:[#allocation2 + $0x68] sm:$0xff]  ;;  %v1712_v0 = vld [vmem:[%s3795_s11 + $0x60] sm:$0xff] }
 0x401   :  { %v2812_v25 = vpack.c.bf16 %v1239_v20, %v1238_v19  ;;  %v1513_v19 = vld [vmem:[#allocation2 + $0x178] sm:$0xff]  ;;  %2566 = vmatprep.mubr.msk.f32.mxu0 %vm3101_vm2, %v3102_v22 }
 0x402   :  { %2795 = vmatpush3.bf16.msra.mxu1 %v2792_v4  ;;  %v1500_v4 = vld [vmem:[#allocation2 + $0x110] sm:$0xff] }
 0x403   :  { %2797 = vmatprep.subr.bf16.mxu1 %v2796_v9  ;;  %v2864_v8 = vpack.c.bf16 %v1501_v6, %v1500_v4  ;;  %v1714_v4 = vld [vmem:[%s3795_s11 + $0x70] sm:$0xff]  ;;  %v1715_v6 = vld [vmem:[%s3795_s11 + $0x78] sm:$0xff] }
 0x406   :  { %2799 = vmatpush3.bf16.msra.mxu1 %v2796_v9  ;;  %v1502_v9 = vld [vmem:[#allocation2 + $0x120] sm:$0xff] }
 0x407   :  { %2801 = vmatprep.subr.bf16.mxu1 %v2800_v23  ;;  %v2868_v10 = vpack.c.bf16 %v1503_v15, %v1502_v9 }
 0x40a   :  { %2803 = vmatpush3.bf16.msra.mxu1 %v2800_v23  ;;  %v1504_v23 = vld [vmem:[#allocation2 + $0x130] sm:$0xff] }
 0x40b   :  { %2805 = vmatprep.subr.bf16.mxu1 %v2804_v16  ;;  %v2872_v13 = vpack.c.bf16 %v1505_v11, %v1504_v23 }
 0x40e   :  { %2807 = vmatpush3.bf16.msra.mxu1 %v2804_v16  ;;  %v1506_v16 = vld [vmem:[#allocation2 + $0x140] sm:$0xff] }
 0x40f   :  { %2809 = vmatprep.subr.bf16.mxu1 %v2808_v18  ;;  %v2876_v50 = vpack.c.bf16 %v1507_v24, %v1506_v16 }
 0x412   :  { %2811 = vmatpush3.bf16.msra.mxu1 %v2808_v18  ;;  %v1511_v18 = vld [vmem:[#allocation2 + $0x168] sm:$0xff] }
 0x413   :  { %2813 = vmatprep.subr.bf16.mxu1 %v2812_v25  ;;  %v2884_v56 = vpack.c.bf16 %v1511_v18, %v1510_v14 }
 0x416   :  { %2815 = vmatpush3.bf16.msra.mxu1 %v2812_v25  ;;  %v3100_v25 = vmov 0.0|0.0  }
 0x417   :  { %2817 = vmatprep.subr.bf16.mxu1 %v2816_v27  ;;  %2892 = vmatprep.subr.bf16.mxu0 %v3100_v25 }
 0x41a   :  { %2819 = vmatpush3.bf16.msra.mxu1 %v2816_v27 }
 0x41b   :  { %2821 = vmatprep.subr.bf16.mxu1 %v2820_v30 }
 0x4cf   :  { %v2426_v33 = vpop.f32.mrb[8].mxu1  ;;  %v3610_v34 = vpop.f32.mrb[16].mxu0 }
 0x4d0   :  { %v1207_v35 = vpop.f32.mrb[9].mxu1  ;;  %v1478_v37 = vpop.f32.mrb[17].mxu0 }
 0x4d1   :  { %2462 = vmatprep.mubr.f32.mxu1 %v1207_v35 }
 0x4d2   :  { %2463 = vmatmul.mubr.f32.vlgmr.msra.gmra.mrb[12].mxu1 %v2426_v33 }
 0x4d3   :  { %2823 = vmatpush3.bf16.msra.mxu1 %v2820_v30  ;;  %v2429_v39 = vpop.f32.mrb[10].mxu1  ;;  %v3612_v40 = vpop.f32.mrb[18].mxu0 }
 0x4d4   :  { %v1217_v41 = vpop.f32.mrb[11].mxu1  ;;  %2825 = vmatprep.subr.bf16.mxu1 %v2824_v36  ;;  %v3614_v43 = vpop.f32.mrb[19].mxu0 }
 0x4d5   :  { %2465 = vmatprep.mubr.f32.mxu1 %v1217_v41 }
 0x4d6   :  { %2466 = vmatmul.mubr.f32.gmra.mrb[14].mxu1 %v2429_v39 }
 0x4d7   :  { %2827 = vmatpush3.bf16.msra.mxu1 %v2824_v36  ;;  %2500 = vmatprep.mubr.f32.mxu1 %v1120_v51  ;;  %v2848_v51 = vpack.c.bf16 %v1140_v53, %v1139_v63  ;;  %v1710_v63 = vld [vmem:[%s3795_s11 + $0x50] sm:$0xff]  ;;  %v1711_v53 = vld [vmem:[%s3795_s11 + $0x58] sm:$0xff] }
 0x4d8   :  { %2829 = vmatprep.subr.bf16.mxu1 %v2828_v42 }
 0x4db   :  { %2831 = vmatpush3.bf16.msra.mxu1 %v2828_v42 }
 0x4dc   :  { %2833 = vmatprep.subr.bf16.mxu1 %v2832_v46 }
 0x4df   :  { %2835 = vmatpush3.bf16.msra.mxu1 %v2832_v46  ;;  %v2902_v46 = vpack.c.bf16 %v1703_v45, %v1702_v44 }
 0x4e0   :  { %2837 = vmatprep.subr.bf16.mxu1 %v2836_v49 }
 0x4e3   :  { %2839 = vmatpush3.bf16.msra.mxu1 %v2836_v49  ;;  %v2905_v49 = vpack.c.bf16 %v1705_v48, %v1704_v47 }
 0x4e4   :  { %2841 = vmatprep.subr.bf16.mxu1 %v2840_v57 }
 0x4e7   :  { %2843 = vmatpush3.bf16.msra.mxu1 %v2840_v57  ;;  %v2908_v57 = vpack.c.bf16 %v1707_v55, %v1706_v52 }
 0x4e8   :  { %2845 = vmatprep.subr.bf16.mxu1 %v2844_v61 }
 0x4eb   :  { %2847 = vmatpush3.bf16.msra.mxu1 %v2844_v61  ;;  %v2911_v61 = vpack.c.bf16 %v1709_v60, %v1708_v21 }
 0x4ec   :  { %2849 = vmatprep.subr.bf16.mxu1 %v2848_v51 }
 0x4ef   :  { %2851 = vmatpush3.bf16.msra.mxu1 %v2848_v51  ;;  %v2914_v51 = vpack.c.bf16 %v1711_v53, %v1710_v63 }
 0x4f0   :  { %2861 = vmatprep.subr.bf16.mxu1 %v2860_v2 }
 0x4f2   :  { %2501 = vmatmul.mubr.f32.vlgmr.msra.gmra.mrb[12].mxu1 %v1121_v54  ;;  %v1508_v54 = vld [vmem:[#allocation2 + $0x150] sm:$0xff] }
 0x4f3   :  { %2503 = vmatprep.mubr.f32.mxu1 %v1122_v62  ;;  %2863 = vmatpush3.bf16.msra.mxu1 %v2860_v2  ;;  %v2880_v62 = vpack.c.bf16 %v1509_v58, %v1508_v54  ;;  %v2917_v2 = vpack.c.bf16 %v1713_v1, %v1712_v0 }
 0x4f4   :  { %2865 = vmatprep.subr.bf16.mxu1 %v2864_v8 }
 0x4f6   :  { %2504 = vmatmul.mubr.f32.gmra.mrb[14].mxu1 %v1123_v59  ;;  %v1512_v59 = vld [vmem:[#allocation2 + $0x170] sm:$0xff] }
 0x4f7   :  { %2867 = vmatpush3.bf16.msra.mxu1 %v2864_v8  ;;  %2552 = vmatprep.mubr.f32.mxu1 %v1478_v37  ;;  %v2888_v20 = vpack.c.bf16 %v1513_v19, %v1512_v59  ;;  %v2920_v8 = vpack.c.bf16 %v1715_v6, %v1714_v4 }
 0x4f8   :  { %2869 = vmatprep.subr.bf16.mxu1 %v2868_v10 }
 0x4fb   :  { %2871 = vmatpush3.bf16.msra.mxu1 %v2868_v10 }
 0x4fc   :  { %2873 = vmatprep.subr.bf16.mxu1 %v2872_v13 }
 0x4ff   :  { %2875 = vmatpush3.bf16.msra.mxu1 %v2872_v13 }
 0x500   :  { %2877 = vmatprep.subr.bf16.mxu1 %v2876_v50 }
 0x503   :  { %2879 = vmatpush3.bf16.msra.mxu1 %v2876_v50 }
 0x504   :  { %2881 = vmatprep.subr.bf16.mxu1 %v2880_v62 }
 0x507   :  { %2883 = vmatpush3.bf16.msra.mxu1 %v2880_v62 }
 0x508   :  { %2885 = vmatprep.subr.bf16.mxu1 %v2884_v56 }
 0x50b   :  { %2887 = vmatpush3.bf16.msra.mxu1 %v2884_v56 }
 0x50c   :  { %2889 = vmatprep.subr.bf16.mxu1 %v2888_v20 }
 0x50f   :  { %2891 = vmatpush3.bf16.msra.mxu1 %v2888_v20 }
 0x512   :  { %2553 = vmatmul.mubr.f32.vlgmr.msra.gmra.mrb[12].mxu1 %v3610_v34 }
 0x513   :  { %2555 = vmatprep.mubr.f32.mxu1 %v3614_v43 }
 0x516   :  { %2556 = vmatmul.mubr.f32.gmra.mrb[14].mxu1 %v3612_v40 }
 0x5e5   :  { %v2554_v27 = vpop.f32.mrb[12].mxu1 }
 0x5e6   :  { %v1611_v28 = vadd.f32 %v2554_v27, %v1952_v26  ;;  %v1580_v29 = vpop.f32.mrb[13].mxu1 }
 0x5e7   :  { %v1610_v30 = vadd.f32 %v1952_v26, %v1580_v29 }
 0x5e8   :  { %v1615_v31 = vadd.f32 %v1611_v28, %v3386_v3  ;;  %v1700_v3 = vld [vmem:[%s3795_s11] sm:$0xff] }
 0x5e9   :  { %v1614_v32 = vadd.f32 %v1610_v30, %v3388_v7  ;;  %v2557_v33 = vpop.f32.mrb[14].mxu1  ;;  %v1701_v7 = vld [vmem:[%s3795_s11 + $0x8] sm:$0xff] }
 0x5ea   :  { %v1619_v34 = vmax.f32 %v1615_v31, 0.0  ;;  %v1613_v35 = vadd.f32 %v2557_v33, %v1952_v26  ;;  %v1590_v36 = vpop.f32.mrb[15].mxu1  ;;  %v2899_v43 = vpack.c.bf16 %v1701_v7, %v1700_v3 }
 0x5eb   :  { %v1618_v37 = vmax.f32 %v1614_v32, 0.0  ;;  %v1612_v5 = vadd.f32 %v1952_v26, %v1590_v36 }
 0x5ec   :  { %1623 = vst [vmem:[#allocation9 + $0x8] sm:$0xff] %v1619_v34  ;;  %v1617_v38 = vadd.f32 %v1613_v35, %v3394_v12 }
 0x5ed   :  { %1622 = vst [vmem:[#allocation9] sm:$0xff] %v1618_v37  ;;  %v2893_v39 = vpack.c.bf16 %v1619_v34, %v1618_v37  ;;  %v1616_v40 = vadd.f32 %v1612_v5, %v3402_v17  ;;  %v1626_v17 = vld [vmem:[%s3794_s10] sm:$0x3] }
 0x5ee   :  { %v1621_v41 = vmax.f32 %v1617_v38, 0.0 }
 0x5ef   :  { %v1620_v42 = vmax.f32 %v1616_v40, 0.0  ;;  %2894 = vmatpush3.bf16.msra.mxu0 %v2893_v39 }
 0x5f0   :  { %1625 = vst [vmem:[#allocation9 + $0x18] sm:$0xff] %v1621_v41  ;;  %2895 = vmatprep.subr.bf16.mxu0 %v3100_v25 }
 0x5f1   :  { %1624 = vst [vmem:[#allocation9 + $0x10] sm:$0xff] %v1620_v42  ;;  %v2896_v12 = vpack.c.bf16 %v1621_v41, %v1620_v42 }
 0x5f3   :  { %2897 = vmatpush3.bf16.msra.mxu0 %v2896_v12 }
 0x5f4   :  { %2898 = vmatprep.subr.bf16.mxu0 %v3100_v25 }
 0x5f6   :  { %2567 = vmatmul.mubr.msk.f32.vlgmr.msra.gmra.mrb[20].mxu0 %vm84_vm0, %v1626_v17 }
 0x5f7   :  { %2900 = vmatpush3.bf16.msra.mxu0 %v2899_v43  ;;  %2601 = vmatprep.mubr.msk.f32.mxu0 %vm3101_vm2, %v3102_v22 }
 0x5f8   :  { %2901 = vmatprep.subr.bf16.mxu0 %v3100_v25 }
 0x5fb   :  { %2903 = vmatpush3.bf16.msra.mxu0 %v2902_v46 }
 0x5fc   :  { %2904 = vmatprep.subr.bf16.mxu0 %v3100_v25 }
 0x5ff   :  { %2906 = vmatpush3.bf16.msra.mxu0 %v2905_v49 }
 0x600   :  { %2907 = vmatprep.subr.bf16.mxu0 %v3100_v25 }
 0x603   :  { %2909 = vmatpush3.bf16.msra.mxu0 %v2908_v57 }
 0x604   :  { %2910 = vmatprep.subr.bf16.mxu0 %v3100_v25 }
 0x607   :  { %2912 = vmatpush3.bf16.msra.mxu0 %v2911_v61 }
 0x608   :  { %2913 = vmatprep.subr.bf16.mxu0 %v3100_v25 }
 0x60b   :  { %2915 = vmatpush3.bf16.msra.mxu0 %v2914_v51 }
 0x60c   :  { %2916 = vmatprep.subr.bf16.mxu0 %v3100_v25 }
 0x60f   :  { %2918 = vmatpush3.bf16.msra.mxu0 %v2917_v2 }
 0x610   :  { %2919 = vmatprep.subr.bf16.mxu0 %v3100_v25 }
 0x613   :  { %2921 = vmatpush3.bf16.msra.mxu0 %v2920_v8 }
 0x6c9   :  { %v1696_v9 = vpop.f32.mrb[20].mxu0 }
 0x6ca   :  { %v2568_v15 = vpop.f32.mrb[21].mxu0  ;;  %2602 = vmatmul.mubr.f32.vlgmr.msra.gmra.mrb[22].mxu0 %v1696_v9 }
 0x6cb   :  { %2990 = shalt.err (!%p2987_p12)
}
 0x6cc   :  { %s2991_s20 = scalar_lea.hbm %s3797_s13, 512 }
 0x6cd   :  { %p2992_p13 = scmp.ne.s32.totalorder %s3797_s13, %s2991_s20  ;;  %p2995_p0 = scmp.lt.u32.totalorder %s2991_s20, %s3797_s13 }
 0x6cf   :  { %p2997_p1 = pnand %p2995_p0, %p2992_p13 }
 0x6d1   :  { %3000 = shalt.err (!%p2997_p1)
}
 0x6d2   :  { %1811 = dma.vmem_to_hbm [thread:$0]  %s1806_s29, 512, %s3797_s13, [#allocation7], %s3098_s0, %s3098_s0, %s3099_s17  }
 0x6d3   :  { %s3001_s23 = scalar_lea.vmem %s3698_s1, 512  ;;  %p3006_p3 = scmp.lt.s32.totalorder %s3698_s1, %s3698_s1 }
 0x6d4   :  { %p3002_p2 = scmp.ne.s32.totalorder %s3698_s1, %s3001_s23  ;;  %p3007_p4 = scmp.lt.s32.totalorder %s3001_s23, %s3001_s23 }
 0x6d6   :  { %p3008_p5 = por %p3007_p4, %p3006_p3 }
 0x6d8   :  { %p3009_p6 = pnand %p3008_p5, %p3002_p2 }
 0x6da   :  { %3012 = shalt.err (!%p3009_p6)
}
 0x6db   :  { %s3013_s25 = scalar_lea.hbm %s3799_s15, 512 }
 0x6dc   :  { %p3014_p7 = scmp.ne.s32.totalorder %s3799_s15, %s3013_s25  ;;  %p3017_p8 = scmp.lt.u32.totalorder %s3013_s25, %s3799_s15 }
 0x6de   :  { %p3019_p9 = pnand %p3017_p8, %p3014_p7 }
 0x6e0   :  { %3022 = shalt.err (!%p3019_p9)
}
 0x6e1   :  { %1835 = dma.vmem_to_hbm [thread:$0]  %s3698_s1, 512, %s3799_s15, [#allocation10], %s3098_s0, %s3098_s0, %s3099_s17  }
 0x6e2   :  { %s3105_s10 = smov [#allocation5]   ;;  %s3106_s29 = smov [#allocation8]  }
 0x6e3   :  { %s1793_s28 = sshll.u32 %s3105_s10, 4  ;;  %s1817_s30 = sshll.u32 %s3106_s29, 4  ;;  %s1794_s28 = int_to_ptr.vmem [resolvable:$true] %s1793_s28  ;;  %s3735_s30 = int_to_ptr.vmem [resolvable:$true] %s1817_s30 }
 0x6e4   :  { %s3023_s18 = scalar_lea.vmem %s1794_s28, 512  ;;  %p3028_p11 = scmp.lt.s32.totalorder %s1794_s28, %s1794_s28 }
 0x6e5   :  { %p3024_p10 = scmp.ne.s32.totalorder %s1794_s28, %s3023_s18  ;;  %p3029_p12 = scmp.lt.s32.totalorder %s3023_s18, %s3023_s18 }
 0x6e7   :  { %p3030_p13 = por %p3029_p12, %p3028_p11 }
 0x6e9   :  { %p3031_p0 = pnand %p3030_p13, %p3024_p10 }
 0x6eb   :  { %3034 = shalt.err (!%p3031_p0)
}
 0x6ec   :  { %s3035_s20 = scalar_lea.hbm %s3796_s12, 512 }
 0x6ed   :  { %p3036_p1 = scmp.ne.s32.totalorder %s3796_s12, %s3035_s20  ;;  %p3039_p2 = scmp.lt.u32.totalorder %s3035_s20, %s3796_s12 }
 0x6ef   :  { %p3041_p3 = pnand %p3039_p2, %p3036_p1 }
 0x6f1   :  { %3044 = shalt.err (!%p3041_p3)
}
 0x6f2   :  { %1799 = dma.vmem_to_hbm [thread:$0]  %s1794_s28, 512, %s3796_s12, [#allocation4], %s3098_s0, %s3098_s0, %s3099_s17  }
 0x6f3   :  { %s3045_s5 = scalar_lea.vmem %s3735_s30, 512  ;;  %p3050_p5 = scmp.lt.s32.totalorder %s3735_s30, %s3735_s30 }
 0x6f4   :  { %p3046_p4 = scmp.ne.s32.totalorder %s3735_s30, %s3045_s5  ;;  %p3051_p6 = scmp.lt.s32.totalorder %s3045_s5, %s3045_s5 }
 0x6f6   :  { %p3052_p7 = por %p3051_p6, %p3050_p5 }
 0x6f8   :  { %p3053_p8 = pnand %p3052_p7, %p3046_p4 }
 0x6fa   :  { %3056 = shalt.err (!%p3053_p8)
}
 0x6fb   :  { %s3057_s9 = scalar_lea.hbm %s3798_s14, 512 }
 0x6fc   :  { %p3058_p9 = scmp.ne.s32.totalorder %s3798_s14, %s3057_s9  ;;  %p3061_p10 = scmp.lt.u32.totalorder %s3057_s9, %s3798_s14 }
 0x6fe   :  { %p3063_p11 = pnand %p3061_p10, %p3058_p9 }
 0x700   :  { %3066 = shalt.err (!%p3063_p11)
}
 0x701   :  { %1823 = dma.vmem_to_hbm [thread:$0]  %s3735_s30, 512, %s3798_s14, [#allocation7], %s3098_s0, %s3098_s0, %s3099_s17   ;;  %vm1786_vm3 = vcmask 58368  }
 0x702   :  { %s3107_s8 = smov [#allocation11]  }
 0x703   :  { %s1842_s13 = sshll.u32 %s3107_s8, 4  ;;  %s1843_s13 = int_to_ptr.vmem [resolvable:$true] %s1842_s13 }
 0x704   :  { %s3067_s22 = scalar_lea.vmem %s1843_s13, 32  ;;  %p3072_p13 = scmp.lt.s32.totalorder %s1843_s13, %s1843_s13 }
 0x705   :  { %p3068_p12 = scmp.ne.s32.totalorder %s1843_s13, %s3067_s22  ;;  %p3073_p0 = scmp.lt.s32.totalorder %s3067_s22, %s3067_s22 }
 0x707   :  { %p3074_p1 = por %p3073_p0, %p3072_p13 }
 0x709   :  { %p3075_p2 = pnand %p3074_p1, %p3068_p12 }
 0x79d   :  { %v1782_v10 = vpop.f32.mrb[22].mxu0 }
 0x79e   :  { %1787 = vst.msk [vmem:[#allocation11] sm:$0x3] %vm1786_vm3, %v1782_v10  ;;  %v2603_v23 = vpop.f32.mrb[23].mxu0 }
 0x79f   :  { %3078 = shalt.err (!%p3075_p2)
}
 0x7a0   :  { %s3079_s29 = scalar_lea.hbm %s3800_s16, 32 }
 0x7a1   :  { %p3080_p3 = scmp.ne.s32.totalorder %s3800_s16, %s3079_s29  ;;  %p3083_p4 = scmp.lt.u32.totalorder %s3079_s29, %s3800_s16 }
 0x7a3   :  { %p3085_p5 = pnand %p3083_p4, %p3080_p3 }
 0x7a5   :  { %3088 = shalt.err (!%p3085_p5)
}
 0x7a6   :  { %1845 = dma.vmem_to_hbm [thread:$0]  %s1843_s13, 32, %s3800_s16, [#allocation10]  }
 0x7a7   :  { %3091 = dma.done.wait [#allocation4], 512  }
 0x7a8   :  { %3092 = vsyncadd [#allocation4], 4294966784 }
 0x7a9   :  { %3093 = dma.done.wait [#allocation7], 1024  }
 0x7aa   :  { %3094 = vsyncadd [#allocation7], 4294966272 }
 0x7ab   :  { %3095 = dma.done.wait [#allocation10], 544  }
 0x7ac   :  { %3096 = vsyncadd [#allocation10], 4294966752 }
 0x7ad   :  { %1861 = vsyncpa [#allocation3], 1 }
 0x7ae   :  { %1862 = vsyncpa [#allocation4], 1 }
 0x7af   :  { %1863 = vsyncpa [#allocation7], 1 }
 0x7b0   :  { %1864 = vsyncpa [#allocation10], 1 }

</bundles_post_ra>
